<compile_context>
chip_gen: v7x
topology: tpu7x:2x2x1
jax: 0.10.0
libtpu: 0.0.40
codegen_flags: <defaults>
</compile_context>

<pallas_src>
import functools

import jax
import jax.numpy as jnp
from jax import lax
from jax.experimental import pallas as pl
from jax.experimental.pallas import tpu as pltpu

_EPS = 0.001


def _cfm_solve_kernel(z_ref, mu_ref, mask_ref,
                      w1x_ref, w1m_ref, b1_ref, temb_ref,
                      w2dt_ref, b2dt_ref,
                      traj_hbm,
                      x_scr, muh_scr, mask_scr, stage_scr, sem,
                      *, n_timesteps, temperature):
    """One grid step == one full Euler solve for one batch element.

    init : x <- z * temperature
           muh  <- w1m @ mu + b1          (loop-invariant, hoisted)
           maskC <- broadcast(mask, (C,T)) (loop-invariant, hoisted)
           stream traj entry 0
    loop i = 0 .. n_timesteps-1:
           h  = tanh(w1x @ x + muh + num_t(i) * temb)
           x += ((w2*dt) @ h + b2*dt) * maskC
           stream traj entry i+1
    Trajectory entries are DMA'd from a 2-slot VMEM staging buffer to the
    ANY-space HBM output, overlapping the next step's compute.
    """
    b = pl.program_id(0)
    S = n_timesteps + 1                       # trajectory length (static)

    # ---------------- per-batch init (loop-invariant hoists) ----------------
    # traj = [x] with x = z * temperature; as in solve_euler_cfm the initial
    # noise is NOT masked, only the estimator output is masked.
    x_scr[...] = z_ref[0].astype(jnp.float32) * temperature
    muh_scr[...] = (jnp.dot(w1m_ref[...], mu_ref[0],
                            preferred_element_type=jnp.float32)
                    + b1_ref[...])
    mask_scr[...] = jnp.broadcast_to(mask_ref[0].astype(jnp.float32),
                                     mask_scr.shape)

    # --------------- trajectory entry 0 (initial noise) ---------------------
    stage_scr[0] = x_scr[...].astype(stage_scr.dtype)
    pltpu.make_async_copy(stage_scr.at[0], traj_hbm.at[b, 0], sem.at[0]).start()

    # ----------------------- Euler hot loop ---------------------------------
    def euler_body(i, carry):
        # Reference time grid: num_t = i / N * (1 - eps) + eps.
        # (dt = 1/N exactly as in solve_euler_cfm; folded into w2dt/b2dt.)
        num_t = (lax.convert_element_type(i, jnp.float32)
                 * ((1.0 - _EPS) / n_timesteps) + _EPS)
        x = x_scr[...]
        # Synthetic estimator: bf16 MXU operands, f32 accumulation.
        h = jnp.tanh(
            jnp.dot(w1x_ref[...], x.astype(jnp.bfloat16),
                    preferred_element_type=jnp.float32)
            + muh_scr[...] + num_t * temb_ref[...])
        pred_dt = (jnp.dot(w2dt_ref[...], h.astype(jnp.bfloat16),
                           preferred_element_type=jnp.float32)
                   + b2dt_ref[...]) * mask_scr[...]
        x_scr[...] = x + pred_dt              # x <- x + pred * dt

        # Stream trajectory entry s = i + 1 (double-buffered writeback).
        s = i + 1
        slot = s % 2

        @pl.when(s >= 2)                      # slot reused -> wait for its DMA
        def _wait_slot():
            # Only the semaphore + transfer size matter for the wait.
            pltpu.make_async_copy(stage_scr.at[slot], traj_hbm.at[b, s],
                                  sem.at[slot]).wait()

        stage_scr[slot] = x_scr[...].astype(stage_scr.dtype)
        pltpu.make_async_copy(stage_scr.at[slot], traj_hbm.at[b, s],
                              sem.at[slot]).start()
        return carry

    lax.fori_loop(0, n_timesteps, euler_body, 0,
                  unroll=bool(n_timesteps <= 8))

    # Drain outstanding trajectory DMAs before the next batch reuses the slots.
    for s_last in range(max(0, S - 2), S):    # static Python range
        pltpu.make_async_copy(stage_scr.at[s_last % 2], traj_hbm.at[b, s_last],
                              sem.at[s_last % 2]).wait()


def make_estimator_params(n_feats, hidden, key):
    """Deterministic synthetic estimator parameters (f32 master copies)."""
    k1, k2, k3, k4, k5, k6 = jax.random.split(key, 6)
    scale_in = 1.0 / jnp.sqrt(jnp.float32(n_feats))
    scale_h = 1.0 / jnp.sqrt(jnp.float32(hidden))
    return {
        "w1x": jax.random.normal(k1, (hidden, n_feats), jnp.float32) * scale_in,
        "w1m": jax.random.normal(k2, (hidden, n_feats), jnp.float32) * scale_in,
        "b1":  jax.random.normal(k3, (hidden, 1), jnp.float32) * 0.1,
        "temb": jax.random.normal(k4, (hidden, 1), jnp.float32),
        "w2":  jax.random.normal(k5, (n_feats, hidden), jnp.float32) * scale_h,
        "b2":  jax.random.normal(k6, (n_feats, 1), jnp.float32) * 0.1,
    }


def _prepare_operands(mu, mask, n_timesteps, params):
    """Cast MXU operands to bf16 and fold dt into the output layer (once)."""
    dt = 1.0 / n_timesteps
    return dict(
        mu_bf=mu.astype(jnp.bfloat16),
        mask_f=mask.astype(jnp.float32),
        w1x=params["w1x"].astype(jnp.bfloat16),
        w1m=params["w1m"].astype(jnp.bfloat16),
        b1=params["b1"].astype(jnp.float32),
        temb=params["temb"].astype(jnp.float32),
        w2dt=(params["w2"] * dt).astype(jnp.bfloat16),
        b2dt=params["b2"].astype(jnp.float32) * dt,
    )


def consistency_fm_forward(mu, mask, n_timesteps, params, *, temperature=1.0,
                           noise_key=None, z=None, traj_dtype=jnp.bfloat16):
    """Equivalent of BaseConsistencyFM.forward.

    Returns the stacked trajectory (B, n_timesteps + 1, C, T); traj[:, i] is
    the i-th element of the PyTorch list returned by solve_euler_cfm.
    The trajectory is emitted in `traj_dtype` (bf16 by default) to halve the
    dominant HBM writeback traffic.
    """
    B, C, T = mu.shape
    H = params["w1x"].shape[0]
    S = n_timesteps + 1

    if z is None:
        if noise_key is None:
            noise_key = jax.random.PRNGKey(0)
        z = jax.random.normal(noise_key, mu.shape, jnp.float32)
    # NOTE: temperature is applied inside the kernel (init), not here -- the
    # wrapper-side multiply would be an extra un-hidden HBM pass over z.

    ops = _prepare_operands(mu, mask, n_timesteps, params)

    # Explicit VMEM budget (scratch + double-buffered per-batch inputs +
    # grid-invariant weights), clamped so it stays portable on v7x (64 MiB).
    out_b = jnp.dtype(traj_dtype).itemsize
    est = ((2 * C * T + H * T) * 4 + 2 * C * T * out_b          # scratch
           + 2 * (C * T * 4 + C * T * 2 + T * 4)                # z / mu / mask
           + 2 * (2 * H * C * 2 + C * H * 2 + (2 * H + C) * 4))  # weights
    vmem_limit = int(min(max(2 * est, 16 * (1 << 20)), 48 * (1 << 20)))

    grid_spec = pltpu.PrefetchScalarGridSpec(
        num_scalar_prefetch=0,
        grid=(B,),                                # one grid step per batch elem
        in_specs=[
            pl.BlockSpec((1, C, T), lambda b: (b, 0, 0)),   # z
            pl.BlockSpec((1, C, T), lambda b: (b, 0, 0)),   # mu (bf16)
            pl.BlockSpec((1, 1, T), lambda b: (b, 0, 0)),   # mask
            # Grid-invariant estimator weights (tiny at these shapes).
            # TODO(synk): add pipeline_mode=pl.Buffered(1) to single-buffer
            #             them once an MB-scale real estimator is fused.
            pl.BlockSpec((H, C), lambda b: (0, 0)),          # w1x
            pl.BlockSpec((H, C), lambda b: (0, 0)),          # w1m
            pl.BlockSpec((H, 1), lambda b: (0, 0)),          # b1
            pl.BlockSpec((H, 1), lambda b: (0, 0)),          # temb
            pl.BlockSpec((C, H), lambda b: (0, 0)),          # w2 * dt
            pl.BlockSpec((C, 1), lambda b: (0, 0)),          # b2 * dt
        ],
        # Raw HBM trajectory buffer: written by manual double-buffered DMA so
        # output VMEM footprint is independent of n_timesteps.
        out_specs=pl.BlockSpec(memory_space=pl.ANY),
        scratch_shapes=[
            pltpu.VMEM((C, T), jnp.float32),      # Euler state x (carried)
            pltpu.VMEM((H, T), jnp.float32),      # hoisted w1m @ mu + b1
            pltpu.VMEM((C, T), jnp.float32),      # hoisted broadcast mask
            pltpu.VMEM((2, C, T), traj_dtype),    # traj staging (double buffer)
            pltpu.SemaphoreType.DMA((2,)),        # one DMA sem per staging slot
        ],
    )

    traj = pl.pallas_call(
        functools.partial(_cfm_solve_kernel, n_timesteps=int(n_timesteps),
                          temperature=float(temperature)),
        out_shape=jax.ShapeDtypeStruct((B, S, C, T), traj_dtype),
        grid_spec=grid_spec,
        compiler_params=pltpu.CompilerParams(
            # Batch axis is embarrassingly parallel.
            # TODO(synk): on v7x (2 TC/chip) try pltpu.CORE_PARALLEL here to
            #             shard the batch loop across both TensorCores.
            dimension_semantics=("parallel",),
            vmem_limit_bytes=vmem_limit),
    )(z, ops["mu_bf"], ops["mask_f"],
      ops["w1x"], ops["w1m"], ops["b1"], ops["temb"],
      ops["w2dt"], ops["b2dt"])
    return traj


def consistency_fm_forward_ref(mu, mask, n_timesteps, params, *,
                               temperature=1.0, noise_key=None, z=None,
                               traj_dtype=jnp.bfloat16):
    """Pure-JAX reference (same synthetic bf16 estimator, same time grid)."""
    if z is None:
        if noise_key is None:
            noise_key = jax.random.PRNGKey(0)
        z = jax.random.normal(noise_key, mu.shape, jnp.float32)
    ops = _prepare_operands(mu, mask, n_timesteps, params)
    x = z.astype(jnp.float32) * temperature
    muh = jnp.einsum("hc,bct->bht", ops["w1m"], ops["mu_bf"],
                     preferred_element_type=jnp.float32) + ops["b1"][None]
    traj = [x.astype(traj_dtype)]
    for i in range(n_timesteps):
        num_t = jnp.float32(i) * ((1.0 - _EPS) / n_timesteps) + _EPS
        h = jnp.tanh(
            jnp.einsum("hc,bct->bht", ops["w1x"], x.astype(jnp.bfloat16),
                       preferred_element_type=jnp.float32)
            + muh + num_t * ops["temb"][None])
        pred_dt = (jnp.einsum("ch,bht->bct", ops["w2dt"],
                              h.astype(jnp.bfloat16),
                              preferred_element_type=jnp.float32)
                   + ops["b2dt"][None]) * ops["mask_f"]
        x = x + pred_dt
        traj.append(x.astype(traj_dtype))
    return jnp.stack(traj, axis=1)


if __name__ == "__main__":
    # Small shapes consistent with the module (batch, n_feats, time);
    # T is a multiple of 128 so the lane dimension is dense.
    B, C, T = 2, 32, 256
    H = 64                 # synthetic estimator hidden width
    n_timesteps = 4
    temperature = 0.667

    key = jax.random.PRNGKey(0)
    k_mu, k_noise, k_params = jax.random.split(key, 3)

    mu = jax.random.normal(k_mu, (B, C, T), jnp.float32)
    # mask: (B, 1, T) with a ragged valid length per batch element
    lengths = jnp.array([T, T - 64], dtype=jnp.int32)
    mask = (jnp.arange(T)[None, None, :] < lengths[:, None, None]).astype(
        jnp.float32)

    params = make_estimator_params(C, H, k_params)

    # Sample the noise once so kernel and reference share the exact stream.
    z = jax.random.normal(k_noise, (B, C, T), jnp.float32)

    traj = consistency_fm_forward(mu, mask, n_timesteps, params,
                                  temperature=temperature, z=z,
                                  traj_dtype=jnp.bfloat16)
    traj = jax.block_until_ready(traj)

    S = n_timesteps + 1
    assert traj.shape == (B, S, C, T), traj.shape
    assert traj.dtype == jnp.bfloat16
    assert bool(jnp.all(jnp.isfinite(traj.astype(jnp.float32))))

    # Correctness check against the pure-JAX reference of the same forward.
    ref = jax.block_until_ready(
        consistency_fm_forward_ref(mu, mask, n_timesteps, params,
                                   temperature=temperature, z=z,
                                   traj_dtype=jnp.bfloat16))
    t32, r32 = traj.astype(jnp.float32), ref.astype(jnp.float32)
    max_err = float(jnp.max(jnp.abs(t32 - r32)))
    assert bool(jnp.allclose(t32, r32, rtol=3e-2, atol=3e-2)), max_err

    print("KERNEL_OK")
</pallas_src>

<mosaic_0001>
module attributes {stable_mosaic.version = 11 : i64} {
  func.func @_cfm_solve_kernel(%arg0: i32, %arg1: memref<1x32x256xf32, #tpu.memory_space<vmem>>, %arg2: memref<1x32x256xbf16, #tpu.memory_space<vmem>>, %arg3: memref<1x1x256xf32, #tpu.memory_space<vmem>>, %arg4: memref<64x32xbf16, #tpu.memory_space<vmem>>, %arg5: memref<64x32xbf16, #tpu.memory_space<vmem>>, %arg6: memref<64x1xf32, #tpu.memory_space<vmem>>, %arg7: memref<64x1xf32, #tpu.memory_space<vmem>>, %arg8: memref<32x64xbf16, #tpu.memory_space<vmem>>, %arg9: memref<32x1xf32, #tpu.memory_space<vmem>>, %arg10: memref<2x5x32x256xbf16, #tpu.memory_space<any>>, %arg11: memref<32x256xf32, #tpu.memory_space<vmem>>, %arg12: memref<64x256xf32, #tpu.memory_space<vmem>>, %arg13: memref<32x256xf32, #tpu.memory_space<vmem>>, %arg14: memref<2x32x256xbf16, #tpu.memory_space<vmem>>, %arg15: memref<2x!tpu.dma_semaphore, #tpu.memory_space<semaphore_mem>>) attributes {dimension_semantics = [#tpu.dimension_semantics<parallel>], iteration_bounds = array<i64: 2>, scalar_prefetch = 0 : i64, scratch_operands = 5 : i64, tpu.core_type = #tpu.core_type<tc>, window_params = [{transform_indices = @transform_0, window_bounds = array<i64: 1, 32, 256>}, {transform_indices = @transform_1, window_bounds = array<i64: 1, 32, 256>}, {transform_indices = @transform_2, window_bounds = array<i64: 1, 1, 256>}, {pipeline_mode = #tpu.pipeline_mode<synchronous>, transform_indices = @transform_3, window_bounds = array<i64: 64, 32>}, {pipeline_mode = #tpu.pipeline_mode<synchronous>, transform_indices = @transform_4, window_bounds = array<i64: 64, 32>}, {pipeline_mode = #tpu.pipeline_mode<synchronous>, transform_indices = @transform_5, window_bounds = array<i64: 64, 1>}, {pipeline_mode = #tpu.pipeline_mode<synchronous>, transform_indices = @transform_6, window_bounds = array<i64: 64, 1>}, {pipeline_mode = #tpu.pipeline_mode<synchronous>, transform_indices = @transform_7, window_bounds = array<i64: 32, 64>}, {pipeline_mode = #tpu.pipeline_mode<synchronous>, transform_indices = @transform_8, window_bounds = array<i64: 32, 1>}, {}]} {
    %c0 = arith.constant 0 : index
    %c0_0 = arith.constant 0 : index
    %c0_1 = arith.constant 0 : index
    %0 = vector.load %arg1[%c0, %c0_0, %c0_1] : memref<1x32x256xf32, #tpu.memory_space<vmem>>, vector<1x32x256xf32>
    %1 = vector.shape_cast %0 : vector<1x32x256xf32> to vector<32x256xf32>
    %cst = arith.constant 0.666999995 : f32
    %2 = vector.broadcast %cst : f32 to vector<32x256xf32>
    %3 = arith.mulf %1, %2 : vector<32x256xf32>
    %c0_2 = arith.constant 0 : index
    %c0_3 = arith.constant 0 : index
    %4 = vector.load %arg11[%c0_2, %c0_3] : memref<32x256xf32, #tpu.memory_space<vmem>>, vector<32x256xf32>
    tpu.vector_store %arg11[%c0_2, %c0_3], %3 {strides = array<i32>} : memref<32x256xf32, #tpu.memory_space<vmem>>, vector<32x256xf32>,
    %c0_4 = arith.constant 0 : index
    %c0_5 = arith.constant 0 : index
    %5 = vector.load %arg5[%c0_4, %c0_5] : memref<64x32xbf16, #tpu.memory_space<vmem>>, vector<64x32xbf16>
    %c0_6 = arith.constant 0 : index
    %c0_7 = arith.constant 0 : index
    %c0_8 = arith.constant 0 : index
    %6 = vector.load %arg2[%c0_6, %c0_7, %c0_8] : memref<1x32x256xbf16, #tpu.memory_space<vmem>>, vector<1x32x256xbf16>
    %7 = vector.shape_cast %6 : vector<1x32x256xbf16> to vector<32x256xbf16>
    %cst_9 = arith.constant dense<0.000000e+00> : vector<64x256xf32>
    %8 = tpu.matmul %5, %7, %cst_9 {dimension_numbers = #tpu.dot_dimension_numbers<[1], [0], [0], [1], [0, 0, 1, 1], [], []>} : vector<64x32xbf16>, vector<32x256xbf16>, vector<64x256xf32> -> vector<64x256xf32>
    %c0_10 = arith.constant 0 : index
    %c0_11 = arith.constant 0 : index
    %9 = vector.load %arg6[%c0_10, %c0_11] : memref<64x1xf32, #tpu.memory_space<vmem>>, vector<64x1xf32>
    %10 = vector.broadcast %9 : vector<64x1xf32> to vector<64x256xf32>
    %11 = arith.addf %8, %10 : vector<64x256xf32>
    %c0_12 = arith.constant 0 : index
    %c0_13 = arith.constant 0 : index
    %12 = vector.load %arg12[%c0_12, %c0_13] : memref<64x256xf32, #tpu.memory_space<vmem>>, vector<64x256xf32>
    tpu.vector_store %arg12[%c0_12, %c0_13], %11 {strides = array<i32>} : memref<64x256xf32, #tpu.memory_space<vmem>>, vector<64x256xf32>,
    %c0_14 = arith.constant 0 : index
    %c0_15 = arith.constant 0 : index
    %c0_16 = arith.constant 0 : index
    %13 = vector.load %arg3[%c0_14, %c0_15, %c0_16] : memref<1x1x256xf32, #tpu.memory_space<vmem>>, vector<1x1x256xf32>
    %14 = vector.shape_cast %13 : vector<1x1x256xf32> to vector<1x256xf32>
    %15 = vector.shape_cast %14 : vector<1x256xf32> to vector<1x256xf32>
    %16 = vector.broadcast %15 : vector<1x256xf32> to vector<32x256xf32>
    %c0_17 = arith.constant 0 : index
    %c0_18 = arith.constant 0 : index
    %17 = vector.load %arg13[%c0_17, %c0_18] : memref<32x256xf32, #tpu.memory_space<vmem>>, vector<32x256xf32>
    tpu.vector_store %arg13[%c0_17, %c0_18], %16 {strides = array<i32>} : memref<32x256xf32, #tpu.memory_space<vmem>>, vector<32x256xf32>,
    %c0_19 = arith.constant 0 : index
    %c0_20 = arith.constant 0 : index
    %18 = vector.load %arg11[%c0_19, %c0_20] : memref<32x256xf32, #tpu.memory_space<vmem>>, vector<32x256xf32>
    %19 = arith.truncf %18 : vector<32x256xf32> to vector<32x256xbf16>
    %c0_21 = arith.constant 0 : index
    %c0_22 = arith.constant 0 : index
    %c0_23 = arith.constant 0 : index
    %20 = vector.load %arg14[%c0_21, %c0_22, %c0_23] : memref<2x32x256xbf16, #tpu.memory_space<vmem>>, vector<1x32x256xbf16>
    %21 = vector.shape_cast %20 : vector<1x32x256xbf16> to vector<32x256xbf16>
    %22 = vector.shape_cast %19 : vector<32x256xbf16> to vector<1x32x256xbf16>
    tpu.vector_store %arg14[%c0_21, %c0_22, %c0_23], %22 {strides = array<i32>} : memref<2x32x256xbf16, #tpu.memory_space<vmem>>, vector<1x32x256xbf16>,
    %c0_i32 = arith.constant 0 : i32
    %c0_i32_24 = arith.constant 0 : i32
    %c0_i32_25 = arith.constant 0 : i32
    %c0_i32_26 = arith.constant 0 : i32
    %c0_i32_27 = arith.constant 0 : i32
    %23 = tpu.memref_slice %arg14[%c0_i32, %c0_i32_26, %c0_i32_27] : memref<2x32x256xbf16, #tpu.memory_space<vmem>> -> memref<1x32x256xbf16, #tpu.memory_space<vmem>>
    %24 = tpu.memref_squeeze %23 : memref<1x32x256xbf16, #tpu.memory_space<vmem>> -> memref<32x256xbf16, #tpu.memory_space<vmem>>
    %c0_i32_28 = arith.constant 0 : i32
    %c0_i32_29 = arith.constant 0 : i32
    %25 = tpu.memref_slice %arg10[%arg0, %c0_i32_24, %c0_i32_28, %c0_i32_29] : memref<2x5x32x256xbf16, #tpu.memory_space<any>> -> memref<1x1x32x256xbf16, #tpu.memory_space<any>>
    %26 = tpu.memref_squeeze %25 : memref<1x1x32x256xbf16, #tpu.memory_space<any>> -> memref<32x256xbf16, #tpu.memory_space<any>>
    %27 = tpu.memref_slice %arg15[%c0_i32_25] : memref<2x!tpu.dma_semaphore, #tpu.memory_space<semaphore_mem>> -> memref<1x!tpu.dma_semaphore, #tpu.memory_space<semaphore_mem>>
    %28 = tpu.memref_squeeze %27 : memref<1x!tpu.dma_semaphore, #tpu.memory_space<semaphore_mem>> -> memref<!tpu.dma_semaphore, #tpu.memory_space<semaphore_mem>>
    tpu.enqueue_dma source(%24 : memref<32x256xbf16, #tpu.memory_space<vmem>>) target(%26 : memref<32x256xbf16, #tpu.memory_space<any>>) target_semaphore(%28 : memref<!tpu.dma_semaphore, #tpu.memory_space<semaphore_mem>>)
    %c0_i32_30 = arith.constant 0 : i32
    %29 = arith.sitofp %c0_i32_30 : i32 to f32
    %cst_31 = arith.constant 2.497500e-01 : f32
    %30 = arith.mulf %29, %cst_31 : f32
    %cst_32 = arith.constant 1.000000e-03 : f32
    %31 = arith.addf %30, %cst_32 : f32
    %c0_33 = arith.constant 0 : index
    %c0_34 = arith.constant 0 : index
    %32 = vector.load %arg11[%c0_33, %c0_34] : memref<32x256xf32, #tpu.memory_space<vmem>>, vector<32x256xf32>
    %c0_35 = arith.constant 0 : index
    %c0_36 = arith.constant 0 : index
    %33 = vector.load %arg4[%c0_35, %c0_36] : memref<64x32xbf16, #tpu.memory_space<vmem>>, vector<64x32xbf16>
    %34 = arith.truncf %32 : vector<32x256xf32> to vector<32x256xbf16>
    %cst_37 = arith.constant dense<0.000000e+00> : vector<64x256xf32>
    %35 = tpu.matmul %33, %34, %cst_37 {dimension_numbers = #tpu.dot_dimension_numbers<[1], [0], [0], [1], [0, 0, 1, 1], [], []>} : vector<64x32xbf16>, vector<32x256xbf16>, vector<64x256xf32> -> vector<64x256xf32>
    %c0_38 = arith.constant 0 : index
    %c0_39 = arith.constant 0 : index
    %36 = vector.load %arg12[%c0_38, %c0_39] : memref<64x256xf32, #tpu.memory_space<vmem>>, vector<64x256xf32>
    %37 = arith.addf %35, %36 : vector<64x256xf32>
    %c0_40 = arith.constant 0 : index
    %c0_41 = arith.constant 0 : index
    %38 = vector.load %arg7[%c0_40, %c0_41] : memref<64x1xf32, #tpu.memory_space<vmem>>, vector<64x1xf32>
    %39 = vector.broadcast %31 : f32 to vector<64x1xf32>
    %40 = arith.mulf %39, %38 : vector<64x1xf32>
    %41 = vector.broadcast %40 : vector<64x1xf32> to vector<64x256xf32>
    %42 = arith.addf %37, %41 : vector<64x256xf32>
    %43 = math.tanh %42 : vector<64x256xf32>
    %c0_42 = arith.constant 0 : index
    %c0_43 = arith.constant 0 : index
    %44 = vector.load %arg8[%c0_42, %c0_43] : memref<32x64xbf16, #tpu.memory_space<vmem>>, vector<32x64xbf16>
    %45 = arith.truncf %43 : vector<64x256xf32> to vector<64x256xbf16>
    %cst_44 = arith.constant dense<0.000000e+00> : vector<32x256xf32>
    %46 = tpu.matmul %44, %45, %cst_44 {dimension_numbers = #tpu.dot_dimension_numbers<[1], [0], [0], [1], [0, 0, 1, 1], [], []>} : vector<32x64xbf16>, vector<64x256xbf16>, vector<32x256xf32> -> vector<32x256xf32>
    %c0_45 = arith.constant 0 : index
    %c0_46 = arith.constant 0 : index
    %47 = vector.load %arg9[%c0_45, %c0_46] : memref<32x1xf32, #tpu.memory_space<vmem>>, vector<32x1xf32>
    %48 = vector.broadcast %47 : vector<32x1xf32> to vector<32x256xf32>
    %49 = arith.addf %46, %48 : vector<32x256xf32>
    %c0_47 = arith.constant 0 : index
    %c0_48 = arith.constant 0 : index
    %50 = vector.load %arg13[%c0_47, %c0_48] : memref<32x256xf32, #tpu.memory_space<vmem>>, vector<32x256xf32>
    %51 = arith.mulf %49, %50 : vector<32x256xf32>
    %52 = arith.addf %32, %51 : vector<32x256xf32>
    %c0_49 = arith.constant 0 : index
    %c0_50 = arith.constant 0 : index
    %53 = vector.load %arg11[%c0_49, %c0_50] : memref<32x256xf32, #tpu.memory_space<vmem>>, vector<32x256xf32>
    tpu.vector_store %arg11[%c0_49, %c0_50], %52 {strides = array<i32>} : memref<32x256xf32, #tpu.memory_space<vmem>>, vector<32x256xf32>,
    %c1_i32 = arith.constant 1 : i32
    %54 = arith.addi %c0_i32_30, %c1_i32 : i32
    %c2_i32 = arith.constant 2 : i32
    %c0_i32_51 = arith.constant 0 : i32
    %55 = arith.cmpi eq, %c2_i32, %c0_i32_51 : i32
    %c1_i32_52 = arith.constant 1 : i32
    %56 = arith.select %55, %c1_i32_52, %c2_i32 : i32
    %57 = arith.remsi %54, %56 : i32
    %c0_i32_53 = arith.constant 0 : i32
    %58 = arith.cmpi ne, %57, %c0_i32_53 : i32
    %c0_i32_54 = arith.constant 0 : i32
    %59 = arith.cmpi slt, %57, %c0_i32_54 : i32
    %c0_i32_55 = arith.constant 0 : i32
    %60 = arith.cmpi slt, %56, %c0_i32_55 : i32
    %61 = arith.xori %59, %60 : i1
    %62 = arith.andi %61, %58 : i1
    %63 = arith.addi %57, %56 : i32
    %64 = arith.select %62, %63, %57 : i32
    %c2_i32_56 = arith.constant 2 : i32
    %65 = arith.cmpi sge, %54, %c2_i32_56 : i32
    %66 = arith.extui %65 : i1 to i32
    %c0_i32_57 = arith.constant 0 : i32
    %67 = arith.cmpi ne, %66, %c0_i32_57 : i32
    scf.if %67 {
      %c0_i32_193 = arith.constant 0 : i32
      %c0_i32_194 = arith.constant 0 : i32
      %245 = tpu.memref_slice %arg14[%64, %c0_i32_193, %c0_i32_194] : memref<2x32x256xbf16, #tpu.memory_space<vmem>> -> memref<1x32x256xbf16, #tpu.memory_space<vmem>>
      %246 = tpu.memref_squeeze %245 : memref<1x32x256xbf16, #tpu.memory_space<vmem>> -> memref<32x256xbf16, #tpu.memory_space<vmem>>
      %c0_i32_195 = arith.constant 0 : i32
      %c0_i32_196 = arith.constant 0 : i32
      %247 = tpu.memref_slice %arg10[%arg0, %54, %c0_i32_195, %c0_i32_196] : memref<2x5x32x256xbf16, #tpu.memory_space<any>> -> memref<1x1x32x256xbf16, #tpu.memory_space<any>>
      %248 = tpu.memref_squeeze %247 : memref<1x1x32x256xbf16, #tpu.memory_space<any>> -> memref<32x256xbf16, #tpu.memory_space<any>>
      %249 = tpu.memref_slice %arg15[%64] : memref<2x!tpu.dma_semaphore, #tpu.memory_space<semaphore_mem>> -> memref<1x!tpu.dma_semaphore, #tpu.memory_space<semaphore_mem>>
      %250 = tpu.memref_squeeze %249 : memref<1x!tpu.dma_semaphore, #tpu.memory_space<semaphore_mem>> -> memref<!tpu.dma_semaphore, #tpu.memory_space<semaphore_mem>>
      tpu.wait_dma2 semaphore(%250 : memref<!tpu.dma_semaphore, #tpu.memory_space<semaphore_mem>>) src(%246 : memref<32x256xbf16, #tpu.memory_space<vmem>>) dst(%248 : memref<32x256xbf16, #tpu.memory_space<any>>)
    } else {
    }
    %c0_58 = arith.constant 0 : index
    %c0_59 = arith.constant 0 : index
    %68 = vector.load %arg11[%c0_58, %c0_59] : memref<32x256xf32, #tpu.memory_space<vmem>>, vector<32x256xf32>
    %69 = arith.truncf %68 : vector<32x256xf32> to vector<32x256xbf16>
    %70 = arith.index_cast %64 : i32 to index
    %c0_60 = arith.constant 0 : index
    %c0_61 = arith.constant 0 : index
    %71 = vector.load %arg14[%70, %c0_60, %c0_61] : memref<2x32x256xbf16, #tpu.memory_space<vmem>>, vector<1x32x256xbf16>
    %72 = vector.shape_cast %71 : vector<1x32x256xbf16> to vector<32x256xbf16>
    %73 = vector.shape_cast %69 : vector<32x256xbf16> to vector<1x32x256xbf16>
    tpu.vector_store %arg14[%70, %c0_60, %c0_61], %73 {strides = array<i32>} : memref<2x32x256xbf16, #tpu.memory_space<vmem>>, vector<1x32x256xbf16>,
    %c0_i32_62 = arith.constant 0 : i32
    %c0_i32_63 = arith.constant 0 : i32
    %74 = tpu.memref_slice %arg14[%64, %c0_i32_62, %c0_i32_63] : memref<2x32x256xbf16, #tpu.memory_space<vmem>> -> memref<1x32x256xbf16, #tpu.memory_space<vmem>>
    %75 = tpu.memref_squeeze %74 : memref<1x32x256xbf16, #tpu.memory_space<vmem>> -> memref<32x256xbf16, #tpu.memory_space<vmem>>
    %c0_i32_64 = arith.constant 0 : i32
    %c0_i32_65 = arith.constant 0 : i32
    %76 = tpu.memref_slice %arg10[%arg0, %54, %c0_i32_64, %c0_i32_65] : memref<2x5x32x256xbf16, #tpu.memory_space<any>> -> memref<1x1x32x256xbf16, #tpu.memory_space<any>>
    %77 = tpu.memref_squeeze %76 : memref<1x1x32x256xbf16, #tpu.memory_space<any>> -> memref<32x256xbf16, #tpu.memory_space<any>>
    %78 = tpu.memref_slice %arg15[%64] : memref<2x!tpu.dma_semaphore, #tpu.memory_space<semaphore_mem>> -> memref<1x!tpu.dma_semaphore, #tpu.memory_space<semaphore_mem>>
    %79 = tpu.memref_squeeze %78 : memref<1x!tpu.dma_semaphore, #tpu.memory_space<semaphore_mem>> -> memref<!tpu.dma_semaphore, #tpu.memory_space<semaphore_mem>>
    tpu.enqueue_dma source(%75 : memref<32x256xbf16, #tpu.memory_space<vmem>>) target(%77 : memref<32x256xbf16, #tpu.memory_space<any>>) target_semaphore(%79 : memref<!tpu.dma_semaphore, #tpu.memory_space<semaphore_mem>>)
    %c1_i32_66 = arith.constant 1 : i32
    %80 = arith.sitofp %c1_i32_66 : i32 to f32
    %cst_67 = arith.constant 2.497500e-01 : f32
    %81 = arith.mulf %80, %cst_67 : f32
    %cst_68 = arith.constant 1.000000e-03 : f32
    %82 = arith.addf %81, %cst_68 : f32
    %c0_69 = arith.constant 0 : index
    %c0_70 = arith.constant 0 : index
    %83 = vector.load %arg11[%c0_69, %c0_70] : memref<32x256xf32, #tpu.memory_space<vmem>>, vector<32x256xf32>
    %c0_71 = arith.constant 0 : index
    %c0_72 = arith.constant 0 : index
    %84 = vector.load %arg4[%c0_71, %c0_72] : memref<64x32xbf16, #tpu.memory_space<vmem>>, vector<64x32xbf16>
    %85 = arith.truncf %83 : vector<32x256xf32> to vector<32x256xbf16>
    %cst_73 = arith.constant dense<0.000000e+00> : vector<64x256xf32>
    %86 = tpu.matmul %84, %85, %cst_73 {dimension_numbers = #tpu.dot_dimension_numbers<[1], [0], [0], [1], [0, 0, 1, 1], [], []>} : vector<64x32xbf16>, vector<32x256xbf16>, vector<64x256xf32> -> vector<64x256xf32>
    %c0_74 = arith.constant 0 : index
    %c0_75 = arith.constant 0 : index
    %87 = vector.load %arg12[%c0_74, %c0_75] : memref<64x256xf32, #tpu.memory_space<vmem>>, vector<64x256xf32>
    %88 = arith.addf %86, %87 : vector<64x256xf32>
    %c0_76 = arith.constant 0 : index
    %c0_77 = arith.constant 0 : index
    %89 = vector.load %arg7[%c0_76, %c0_77] : memref<64x1xf32, #tpu.memory_space<vmem>>, vector<64x1xf32>
    %90 = vector.broadcast %82 : f32 to vector<64x1xf32>
    %91 = arith.mulf %90, %89 : vector<64x1xf32>
    %92 = vector.broadcast %91 : vector<64x1xf32> to vector<64x256xf32>
    %93 = arith.addf %88, %92 : vector<64x256xf32>
    %94 = math.tanh %93 : vector<64x256xf32>
    %c0_78 = arith.constant 0 : index
    %c0_79 = arith.constant 0 : index
    %95 = vector.load %arg8[%c0_78, %c0_79] : memref<32x64xbf16, #tpu.memory_space<vmem>>, vector<32x64xbf16>
    %96 = arith.truncf %94 : vector<64x256xf32> to vector<64x256xbf16>
    %cst_80 = arith.constant dense<0.000000e+00> : vector<32x256xf32>
    %97 = tpu.matmul %95, %96, %cst_80 {dimension_numbers = #tpu.dot_dimension_numbers<[1], [0], [0], [1], [0, 0, 1, 1], [], []>} : vector<32x64xbf16>, vector<64x256xbf16>, vector<32x256xf32> -> vector<32x256xf32>
    %c0_81 = arith.constant 0 : index
    %c0_82 = arith.constant 0 : index
    %98 = vector.load %arg9[%c0_81, %c0_82] : memref<32x1xf32, #tpu.memory_space<vmem>>, vector<32x1xf32>
    %99 = vector.broadcast %98 : vector<32x1xf32> to vector<32x256xf32>
    %100 = arith.addf %97, %99 : vector<32x256xf32>
    %c0_83 = arith.constant 0 : index
    %c0_84 = arith.constant 0 : index
    %101 = vector.load %arg13[%c0_83, %c0_84] : memref<32x256xf32, #tpu.memory_space<vmem>>, vector<32x256xf32>
    %102 = arith.mulf %100, %101 : vector<32x256xf32>
    %103 = arith.addf %83, %102 : vector<32x256xf32>
    %c0_85 = arith.constant 0 : index
    %c0_86 = arith.constant 0 : index
    %104 = vector.load %arg11[%c0_85, %c0_86] : memref<32x256xf32, #tpu.memory_space<vmem>>, vector<32x256xf32>
    tpu.vector_store %arg11[%c0_85, %c0_86], %103 {strides = array<i32>} : memref<32x256xf32, #tpu.memory_space<vmem>>, vector<32x256xf32>,
    %c1_i32_87 = arith.constant 1 : i32
    %105 = arith.addi %c1_i32_66, %c1_i32_87 : i32
    %c2_i32_88 = arith.constant 2 : i32
    %c0_i32_89 = arith.constant 0 : i32
    %106 = arith.cmpi eq, %c2_i32_88, %c0_i32_89 : i32
    %c1_i32_90 = arith.constant 1 : i32
    %107 = arith.select %106, %c1_i32_90, %c2_i32_88 : i32
    %108 = arith.remsi %105, %107 : i32
    %c0_i32_91 = arith.constant 0 : i32
    %109 = arith.cmpi ne, %108, %c0_i32_91 : i32
    %c0_i32_92 = arith.constant 0 : i32
    %110 = arith.cmpi slt, %108, %c0_i32_92 : i32
    %c0_i32_93 = arith.constant 0 : i32
    %111 = arith.cmpi slt, %107, %c0_i32_93 : i32
    %112 = arith.xori %110, %111 : i1
    %113 = arith.andi %112, %109 : i1
    %114 = arith.addi %108, %107 : i32
    %115 = arith.select %113, %114, %108 : i32
    %c2_i32_94 = arith.constant 2 : i32
    %116 = arith.cmpi sge, %105, %c2_i32_94 : i32
    %117 = arith.extui %116 : i1 to i32
    %c0_i32_95 = arith.constant 0 : i32
    %118 = arith.cmpi ne, %117, %c0_i32_95 : i32
    scf.if %118 {
      %c0_i32_193 = arith.constant 0 : i32
      %c0_i32_194 = arith.constant 0 : i32
      %245 = tpu.memref_slice %arg14[%115, %c0_i32_193, %c0_i32_194] : memref<2x32x256xbf16, #tpu.memory_space<vmem>> -> memref<1x32x256xbf16, #tpu.memory_space<vmem>>
      %246 = tpu.memref_squeeze %245 : memref<1x32x256xbf16, #tpu.memory_space<vmem>> -> memref<32x256xbf16, #tpu.memory_space<vmem>>
      %c0_i32_195 = arith.constant 0 : i32
      %c0_i32_196 = arith.constant 0 : i32
      %247 = tpu.memref_slice %arg10[%arg0, %105, %c0_i32_195, %c0_i32_196] : memref<2x5x32x256xbf16, #tpu.memory_space<any>> -> memref<1x1x32x256xbf16, #tpu.memory_space<any>>
      %248 = tpu.memref_squeeze %247 : memref<1x1x32x256xbf16, #tpu.memory_space<any>> -> memref<32x256xbf16, #tpu.memory_space<any>>
      %249 = tpu.memref_slice %arg15[%115] : memref<2x!tpu.dma_semaphore, #tpu.memory_space<semaphore_mem>> -> memref<1x!tpu.dma_semaphore, #tpu.memory_space<semaphore_mem>>
      %250 = tpu.memref_squeeze %249 : memref<1x!tpu.dma_semaphore, #tpu.memory_space<semaphore_mem>> -> memref<!tpu.dma_semaphore, #tpu.memory_space<semaphore_mem>>
      tpu.wait_dma2 semaphore(%250 : memref<!tpu.dma_semaphore, #tpu.memory_space<semaphore_mem>>) src(%246 : memref<32x256xbf16, #tpu.memory_space<vmem>>) dst(%248 : memref<32x256xbf16, #tpu.memory_space<any>>)
    } else {
    }
    %c0_96 = arith.constant 0 : index
    %c0_97 = arith.constant 0 : index
    %119 = vector.load %arg11[%c0_96, %c0_97] : memref<32x256xf32, #tpu.memory_space<vmem>>, vector<32x256xf32>
    %120 = arith.truncf %119 : vector<32x256xf32> to vector<32x256xbf16>
    %121 = arith.index_cast %115 : i32 to index
    %c0_98 = arith.constant 0 : index
    %c0_99 = arith.constant 0 : index
    %122 = vector.load %arg14[%121, %c0_98, %c0_99] : memref<2x32x256xbf16, #tpu.memory_space<vmem>>, vector<1x32x256xbf16>
    %123 = vector.shape_cast %122 : vector<1x32x256xbf16> to vector<32x256xbf16>
    %124 = vector.shape_cast %120 : vector<32x256xbf16> to vector<1x32x256xbf16>
    tpu.vector_store %arg14[%121, %c0_98, %c0_99], %124 {strides = array<i32>} : memref<2x32x256xbf16, #tpu.memory_space<vmem>>, vector<1x32x256xbf16>,
    %c0_i32_100 = arith.constant 0 : i32
    %c0_i32_101 = arith.constant 0 : i32
    %125 = tpu.memref_slice %arg14[%115, %c0_i32_100, %c0_i32_101] : memref<2x32x256xbf16, #tpu.memory_space<vmem>> -> memref<1x32x256xbf16, #tpu.memory_space<vmem>>
    %126 = tpu.memref_squeeze %125 : memref<1x32x256xbf16, #tpu.memory_space<vmem>> -> memref<32x256xbf16, #tpu.memory_space<vmem>>
    %c0_i32_102 = arith.constant 0 : i32
    %c0_i32_103 = arith.constant 0 : i32
    %127 = tpu.memref_slice %arg10[%arg0, %105, %c0_i32_102, %c0_i32_103] : memref<2x5x32x256xbf16, #tpu.memory_space<any>> -> memref<1x1x32x256xbf16, #tpu.memory_space<any>>
    %128 = tpu.memref_squeeze %127 : memref<1x1x32x256xbf16, #tpu.memory_space<any>> -> memref<32x256xbf16, #tpu.memory_space<any>>
    %129 = tpu.memref_slice %arg15[%115] : memref<2x!tpu.dma_semaphore, #tpu.memory_space<semaphore_mem>> -> memref<1x!tpu.dma_semaphore, #tpu.memory_space<semaphore_mem>>
    %130 = tpu.memref_squeeze %129 : memref<1x!tpu.dma_semaphore, #tpu.memory_space<semaphore_mem>> -> memref<!tpu.dma_semaphore, #tpu.memory_space<semaphore_mem>>
    tpu.enqueue_dma source(%126 : memref<32x256xbf16, #tpu.memory_space<vmem>>) target(%128 : memref<32x256xbf16, #tpu.memory_space<any>>) target_semaphore(%130 : memref<!tpu.dma_semaphore, #tpu.memory_space<semaphore_mem>>)
    %c2_i32_104 = arith.constant 2 : i32
    %131 = arith.sitofp %c2_i32_104 : i32 to f32
    %cst_105 = arith.constant 2.497500e-01 : f32
    %132 = arith.mulf %131, %cst_105 : f32
    %cst_106 = arith.constant 1.000000e-03 : f32
    %133 = arith.addf %132, %cst_106 : f32
    %c0_107 = arith.constant 0 : index
    %c0_108 = arith.constant 0 : index
    %134 = vector.load %arg11[%c0_107, %c0_108] : memref<32x256xf32, #tpu.memory_space<vmem>>, vector<32x256xf32>
    %c0_109 = arith.constant 0 : index
    %c0_110 = arith.constant 0 : index
    %135 = vector.load %arg4[%c0_109, %c0_110] : memref<64x32xbf16, #tpu.memory_space<vmem>>, vector<64x32xbf16>
    %136 = arith.truncf %134 : vector<32x256xf32> to vector<32x256xbf16>
    %cst_111 = arith.constant dense<0.000000e+00> : vector<64x256xf32>
    %137 = tpu.matmul %135, %136, %cst_111 {dimension_numbers = #tpu.dot_dimension_numbers<[1], [0], [0], [1], [0, 0, 1, 1], [], []>} : vector<64x32xbf16>, vector<32x256xbf16>, vector<64x256xf32> -> vector<64x256xf32>
    %c0_112 = arith.constant 0 : index
    %c0_113 = arith.constant 0 : index
    %138 = vector.load %arg12[%c0_112, %c0_113] : memref<64x256xf32, #tpu.memory_space<vmem>>, vector<64x256xf32>
    %139 = arith.addf %137, %138 : vector<64x256xf32>
    %c0_114 = arith.constant 0 : index
    %c0_115 = arith.constant 0 : index
    %140 = vector.load %arg7[%c0_114, %c0_115] : memref<64x1xf32, #tpu.memory_space<vmem>>, vector<64x1xf32>
    %141 = vector.broadcast %133 : f32 to vector<64x1xf32>
    %142 = arith.mulf %141, %140 : vector<64x1xf32>
    %143 = vector.broadcast %142 : vector<64x1xf32> to vector<64x256xf32>
    %144 = arith.addf %139, %143 : vector<64x256xf32>
    %145 = math.tanh %144 : vector<64x256xf32>
    %c0_116 = arith.constant 0 : index
    %c0_117 = arith.constant 0 : index
    %146 = vector.load %arg8[%c0_116, %c0_117] : memref<32x64xbf16, #tpu.memory_space<vmem>>, vector<32x64xbf16>
    %147 = arith.truncf %145 : vector<64x256xf32> to vector<64x256xbf16>
    %cst_118 = arith.constant dense<0.000000e+00> : vector<32x256xf32>
    %148 = tpu.matmul %146, %147, %cst_118 {dimension_numbers = #tpu.dot_dimension_numbers<[1], [0], [0], [1], [0, 0, 1, 1], [], []>} : vector<32x64xbf16>, vector<64x256xbf16>, vector<32x256xf32> -> vector<32x256xf32>
    %c0_119 = arith.constant 0 : index
    %c0_120 = arith.constant 0 : index
    %149 = vector.load %arg9[%c0_119, %c0_120] : memref<32x1xf32, #tpu.memory_space<vmem>>, vector<32x1xf32>
    %150 = vector.broadcast %149 : vector<32x1xf32> to vector<32x256xf32>
    %151 = arith.addf %148, %150 : vector<32x256xf32>
    %c0_121 = arith.constant 0 : index
    %c0_122 = arith.constant 0 : index
    %152 = vector.load %arg13[%c0_121, %c0_122] : memref<32x256xf32, #tpu.memory_space<vmem>>, vector<32x256xf32>
    %153 = arith.mulf %151, %152 : vector<32x256xf32>
    %154 = arith.addf %134, %153 : vector<32x256xf32>
    %c0_123 = arith.constant 0 : index
    %c0_124 = arith.constant 0 : index
    %155 = vector.load %arg11[%c0_123, %c0_124] : memref<32x256xf32, #tpu.memory_space<vmem>>, vector<32x256xf32>
    tpu.vector_store %arg11[%c0_123, %c0_124], %154 {strides = array<i32>} : memref<32x256xf32, #tpu.memory_space<vmem>>, vector<32x256xf32>,
    %c1_i32_125 = arith.constant 1 : i32
    %156 = arith.addi %c2_i32_104, %c1_i32_125 : i32
    %c2_i32_126 = arith.constant 2 : i32
    %c0_i32_127 = arith.constant 0 : i32
    %157 = arith.cmpi eq, %c2_i32_126, %c0_i32_127 : i32
    %c1_i32_128 = arith.constant 1 : i32
    %158 = arith.select %157, %c1_i32_128, %c2_i32_126 : i32
    %159 = arith.remsi %156, %158 : i32
    %c0_i32_129 = arith.constant 0 : i32
    %160 = arith.cmpi ne, %159, %c0_i32_129 : i32
    %c0_i32_130 = arith.constant 0 : i32
    %161 = arith.cmpi slt, %159, %c0_i32_130 : i32
    %c0_i32_131 = arith.constant 0 : i32
    %162 = arith.cmpi slt, %158, %c0_i32_131 : i32
    %163 = arith.xori %161, %162 : i1
    %164 = arith.andi %163, %160 : i1
    %165 = arith.addi %159, %158 : i32
    %166 = arith.select %164, %165, %159 : i32
    %c2_i32_132 = arith.constant 2 : i32
    %167 = arith.cmpi sge, %156, %c2_i32_132 : i32
    %168 = arith.extui %167 : i1 to i32
    %c0_i32_133 = arith.constant 0 : i32
    %169 = arith.cmpi ne, %168, %c0_i32_133 : i32
    scf.if %169 {
      %c0_i32_193 = arith.constant 0 : i32
      %c0_i32_194 = arith.constant 0 : i32
      %245 = tpu.memref_slice %arg14[%166, %c0_i32_193, %c0_i32_194] : memref<2x32x256xbf16, #tpu.memory_space<vmem>> -> memref<1x32x256xbf16, #tpu.memory_space<vmem>>
      %246 = tpu.memref_squeeze %245 : memref<1x32x256xbf16, #tpu.memory_space<vmem>> -> memref<32x256xbf16, #tpu.memory_space<vmem>>
      %c0_i32_195 = arith.constant 0 : i32
      %c0_i32_196 = arith.constant 0 : i32
      %247 = tpu.memref_slice %arg10[%arg0, %156, %c0_i32_195, %c0_i32_196] : memref<2x5x32x256xbf16, #tpu.memory_space<any>> -> memref<1x1x32x256xbf16, #tpu.memory_space<any>>
      %248 = tpu.memref_squeeze %247 : memref<1x1x32x256xbf16, #tpu.memory_space<any>> -> memref<32x256xbf16, #tpu.memory_space<any>>
      %249 = tpu.memref_slice %arg15[%166] : memref<2x!tpu.dma_semaphore, #tpu.memory_space<semaphore_mem>> -> memref<1x!tpu.dma_semaphore, #tpu.memory_space<semaphore_mem>>
      %250 = tpu.memref_squeeze %249 : memref<1x!tpu.dma_semaphore, #tpu.memory_space<semaphore_mem>> -> memref<!tpu.dma_semaphore, #tpu.memory_space<semaphore_mem>>
      tpu.wait_dma2 semaphore(%250 : memref<!tpu.dma_semaphore, #tpu.memory_space<semaphore_mem>>) src(%246 : memref<32x256xbf16, #tpu.memory_space<vmem>>) dst(%248 : memref<32x256xbf16, #tpu.memory_space<any>>)
    } else {
    }
    %c0_134 = arith.constant 0 : index
    %c0_135 = arith.constant 0 : index
    %170 = vector.load %arg11[%c0_134, %c0_135] : memref<32x256xf32, #tpu.memory_space<vmem>>, vector<32x256xf32>
    %171 = arith.truncf %170 : vector<32x256xf32> to vector<32x256xbf16>
    %172 = arith.index_cast %166 : i32 to index
    %c0_136 = arith.constant 0 : index
    %c0_137 = arith.constant 0 : index
    %173 = vector.load %arg14[%172, %c0_136, %c0_137] : memref<2x32x256xbf16, #tpu.memory_space<vmem>>, vector<1x32x256xbf16>
    %174 = vector.shape_cast %173 : vector<1x32x256xbf16> to vector<32x256xbf16>
    %175 = vector.shape_cast %171 : vector<32x256xbf16> to vector<1x32x256xbf16>
    tpu.vector_store %arg14[%172, %c0_136, %c0_137], %175 {strides = array<i32>} : memref<2x32x256xbf16, #tpu.memory_space<vmem>>, vector<1x32x256xbf16>,
    %c0_i32_138 = arith.constant 0 : i32
    %c0_i32_139 = arith.constant 0 : i32
    %176 = tpu.memref_slice %arg14[%166, %c0_i32_138, %c0_i32_139] : memref<2x32x256xbf16, #tpu.memory_space<vmem>> -> memref<1x32x256xbf16, #tpu.memory_space<vmem>>
    %177 = tpu.memref_squeeze %176 : memref<1x32x256xbf16, #tpu.memory_space<vmem>> -> memref<32x256xbf16, #tpu.memory_space<vmem>>
    %c0_i32_140 = arith.constant 0 : i32
    %c0_i32_141 = arith.constant 0 : i32
    %178 = tpu.memref_slice %arg10[%arg0, %156, %c0_i32_140, %c0_i32_141] : memref<2x5x32x256xbf16, #tpu.memory_space<any>> -> memref<1x1x32x256xbf16, #tpu.memory_space<any>>
    %179 = tpu.memref_squeeze %178 : memref<1x1x32x256xbf16, #tpu.memory_space<any>> -> memref<32x256xbf16, #tpu.memory_space<any>>
    %180 = tpu.memref_slice %arg15[%166] : memref<2x!tpu.dma_semaphore, #tpu.memory_space<semaphore_mem>> -> memref<1x!tpu.dma_semaphore, #tpu.memory_space<semaphore_mem>>
    %181 = tpu.memref_squeeze %180 : memref<1x!tpu.dma_semaphore, #tpu.memory_space<semaphore_mem>> -> memref<!tpu.dma_semaphore, #tpu.memory_space<semaphore_mem>>
    tpu.enqueue_dma source(%177 : memref<32x256xbf16, #tpu.memory_space<vmem>>) target(%179 : memref<32x256xbf16, #tpu.memory_space<any>>) target_semaphore(%181 : memref<!tpu.dma_semaphore, #tpu.memory_space<semaphore_mem>>)
    %c3_i32 = arith.constant 3 : i32
    %182 = arith.sitofp %c3_i32 : i32 to f32
    %cst_142 = arith.constant 2.497500e-01 : f32
    %183 = arith.mulf %182, %cst_142 : f32
    %cst_143 = arith.constant 1.000000e-03 : f32
    %184 = arith.addf %183, %cst_143 : f32
    %c0_144 = arith.constant 0 : index
    %c0_145 = arith.constant 0 : index
    %185 = vector.load %arg11[%c0_144, %c0_145] : memref<32x256xf32, #tpu.memory_space<vmem>>, vector<32x256xf32>
    %c0_146 = arith.constant 0 : index
    %c0_147 = arith.constant 0 : index
    %186 = vector.load %arg4[%c0_146, %c0_147] : memref<64x32xbf16, #tpu.memory_space<vmem>>, vector<64x32xbf16>
    %187 = arith.truncf %185 : vector<32x256xf32> to vector<32x256xbf16>
    %cst_148 = arith.constant dense<0.000000e+00> : vector<64x256xf32>
    %188 = tpu.matmul %186, %187, %cst_148 {dimension_numbers = #tpu.dot_dimension_numbers<[1], [0], [0], [1], [0, 0, 1, 1], [], []>} : vector<64x32xbf16>, vector<32x256xbf16>, vector<64x256xf32> -> vector<64x256xf32>
    %c0_149 = arith.constant 0 : index
    %c0_150 = arith.constant 0 : index
    %189 = vector.load %arg12[%c0_149, %c0_150] : memref<64x256xf32, #tpu.memory_space<vmem>>, vector<64x256xf32>
    %190 = arith.addf %188, %189 : vector<64x256xf32>
    %c0_151 = arith.constant 0 : index
    %c0_152 = arith.constant 0 : index
    %191 = vector.load %arg7[%c0_151, %c0_152] : memref<64x1xf32, #tpu.memory_space<vmem>>, vector<64x1xf32>
    %192 = vector.broadcast %184 : f32 to vector<64x1xf32>
    %193 = arith.mulf %192, %191 : vector<64x1xf32>
    %194 = vector.broadcast %193 : vector<64x1xf32> to vector<64x256xf32>
    %195 = arith.addf %190, %194 : vector<64x256xf32>
    %196 = math.tanh %195 : vector<64x256xf32>
    %c0_153 = arith.constant 0 : index
    %c0_154 = arith.constant 0 : index
    %197 = vector.load %arg8[%c0_153, %c0_154] : memref<32x64xbf16, #tpu.memory_space<vmem>>, vector<32x64xbf16>
    %198 = arith.truncf %196 : vector<64x256xf32> to vector<64x256xbf16>
    %cst_155 = arith.constant dense<0.000000e+00> : vector<32x256xf32>
    %199 = tpu.matmul %197, %198, %cst_155 {dimension_numbers = #tpu.dot_dimension_numbers<[1], [0], [0], [1], [0, 0, 1, 1], [], []>} : vector<32x64xbf16>, vector<64x256xbf16>, vector<32x256xf32> -> vector<32x256xf32>
    %c0_156 = arith.constant 0 : index
    %c0_157 = arith.constant 0 : index
    %200 = vector.load %arg9[%c0_156, %c0_157] : memref<32x1xf32, #tpu.memory_space<vmem>>, vector<32x1xf32>
    %201 = vector.broadcast %200 : vector<32x1xf32> to vector<32x256xf32>
    %202 = arith.addf %199, %201 : vector<32x256xf32>
    %c0_158 = arith.constant 0 : index
    %c0_159 = arith.constant 0 : index
    %203 = vector.load %arg13[%c0_158, %c0_159] : memref<32x256xf32, #tpu.memory_space<vmem>>, vector<32x256xf32>
    %204 = arith.mulf %202, %203 : vector<32x256xf32>
    %205 = arith.addf %185, %204 : vector<32x256xf32>
    %c0_160 = arith.constant 0 : index
    %c0_161 = arith.constant 0 : index
    %206 = vector.load %arg11[%c0_160, %c0_161] : memref<32x256xf32, #tpu.memory_space<vmem>>, vector<32x256xf32>
    tpu.vector_store %arg11[%c0_160, %c0_161], %205 {strides = array<i32>} : memref<32x256xf32, #tpu.memory_space<vmem>>, vector<32x256xf32>,
    %c1_i32_162 = arith.constant 1 : i32
    %207 = arith.addi %c3_i32, %c1_i32_162 : i32
    %c2_i32_163 = arith.constant 2 : i32
    %c0_i32_164 = arith.constant 0 : i32
    %208 = arith.cmpi eq, %c2_i32_163, %c0_i32_164 : i32
    %c1_i32_165 = arith.constant 1 : i32
    %209 = arith.select %208, %c1_i32_165, %c2_i32_163 : i32
    %210 = arith.remsi %207, %209 : i32
    %c0_i32_166 = arith.constant 0 : i32
    %211 = arith.cmpi ne, %210, %c0_i32_166 : i32
    %c0_i32_167 = arith.constant 0 : i32
    %212 = arith.cmpi slt, %210, %c0_i32_167 : i32
    %c0_i32_168 = arith.constant 0 : i32
    %213 = arith.cmpi slt, %209, %c0_i32_168 : i32
    %214 = arith.xori %212, %213 : i1
    %215 = arith.andi %214, %211 : i1
    %216 = arith.addi %210, %209 : i32
    %217 = arith.select %215, %216, %210 : i32
    %c2_i32_169 = arith.constant 2 : i32
    %218 = arith.cmpi sge, %207, %c2_i32_169 : i32
    %219 = arith.extui %218 : i1 to i32
    %c0_i32_170 = arith.constant 0 : i32
    %220 = arith.cmpi ne, %219, %c0_i32_170 : i32
    scf.if %220 {
      %c0_i32_193 = arith.constant 0 : i32
      %c0_i32_194 = arith.constant 0 : i32
      %245 = tpu.memref_slice %arg14[%217, %c0_i32_193, %c0_i32_194] : memref<2x32x256xbf16, #tpu.memory_space<vmem>> -> memref<1x32x256xbf16, #tpu.memory_space<vmem>>
      %246 = tpu.memref_squeeze %245 : memref<1x32x256xbf16, #tpu.memory_space<vmem>> -> memref<32x256xbf16, #tpu.memory_space<vmem>>
      %c0_i32_195 = arith.constant 0 : i32
      %c0_i32_196 = arith.constant 0 : i32
      %247 = tpu.memref_slice %arg10[%arg0, %207, %c0_i32_195, %c0_i32_196] : memref<2x5x32x256xbf16, #tpu.memory_space<any>> -> memref<1x1x32x256xbf16, #tpu.memory_space<any>>
      %248 = tpu.memref_squeeze %247 : memref<1x1x32x256xbf16, #tpu.memory_space<any>> -> memref<32x256xbf16, #tpu.memory_space<any>>
      %249 = tpu.memref_slice %arg15[%217] : memref<2x!tpu.dma_semaphore, #tpu.memory_space<semaphore_mem>> -> memref<1x!tpu.dma_semaphore, #tpu.memory_space<semaphore_mem>>
      %250 = tpu.memref_squeeze %249 : memref<1x!tpu.dma_semaphore, #tpu.memory_space<semaphore_mem>> -> memref<!tpu.dma_semaphore, #tpu.memory_space<semaphore_mem>>
      tpu.wait_dma2 semaphore(%250 : memref<!tpu.dma_semaphore, #tpu.memory_space<semaphore_mem>>) src(%246 : memref<32x256xbf16, #tpu.memory_space<vmem>>) dst(%248 : memref<32x256xbf16, #tpu.memory_space<any>>)
    } else {
    }
    %c0_171 = arith.constant 0 : index
    %c0_172 = arith.constant 0 : index
    %221 = vector.load %arg11[%c0_171, %c0_172] : memref<32x256xf32, #tpu.memory_space<vmem>>, vector<32x256xf32>
    %222 = arith.truncf %221 : vector<32x256xf32> to vector<32x256xbf16>
    %223 = arith.index_cast %217 : i32 to index
    %c0_173 = arith.constant 0 : index
    %c0_174 = arith.constant 0 : index
    %224 = vector.load %arg14[%223, %c0_173, %c0_174] : memref<2x32x256xbf16, #tpu.memory_space<vmem>>, vector<1x32x256xbf16>
    %225 = vector.shape_cast %224 : vector<1x32x256xbf16> to vector<32x256xbf16>
    %226 = vector.shape_cast %222 : vector<32x256xbf16> to vector<1x32x256xbf16>
    tpu.vector_store %arg14[%223, %c0_173, %c0_174], %226 {strides = array<i32>} : memref<2x32x256xbf16, #tpu.memory_space<vmem>>, vector<1x32x256xbf16>,
    %c0_i32_175 = arith.constant 0 : i32
    %c0_i32_176 = arith.constant 0 : i32
    %227 = tpu.memref_slice %arg14[%217, %c0_i32_175, %c0_i32_176] : memref<2x32x256xbf16, #tpu.memory_space<vmem>> -> memref<1x32x256xbf16, #tpu.memory_space<vmem>>
    %228 = tpu.memref_squeeze %227 : memref<1x32x256xbf16, #tpu.memory_space<vmem>> -> memref<32x256xbf16, #tpu.memory_space<vmem>>
    %c0_i32_177 = arith.constant 0 : i32
    %c0_i32_178 = arith.constant 0 : i32
    %229 = tpu.memref_slice %arg10[%arg0, %207, %c0_i32_177, %c0_i32_178] : memref<2x5x32x256xbf16, #tpu.memory_space<any>> -> memref<1x1x32x256xbf16, #tpu.memory_space<any>>
    %230 = tpu.memref_squeeze %229 : memref<1x1x32x256xbf16, #tpu.memory_space<any>> -> memref<32x256xbf16, #tpu.memory_space<any>>
    %231 = tpu.memref_slice %arg15[%217] : memref<2x!tpu.dma_semaphore, #tpu.memory_space<semaphore_mem>> -> memref<1x!tpu.dma_semaphore, #tpu.memory_space<semaphore_mem>>
    %232 = tpu.memref_squeeze %231 : memref<1x!tpu.dma_semaphore, #tpu.memory_space<semaphore_mem>> -> memref<!tpu.dma_semaphore, #tpu.memory_space<semaphore_mem>>
    tpu.enqueue_dma source(%228 : memref<32x256xbf16, #tpu.memory_space<vmem>>) target(%230 : memref<32x256xbf16, #tpu.memory_space<any>>) target_semaphore(%232 : memref<!tpu.dma_semaphore, #tpu.memory_space<semaphore_mem>>)
    %c4_i32 = arith.constant 4 : i32
    %c1_i32_179 = arith.constant 1 : i32
    %c3_i32_180 = arith.constant 3 : i32
    %c1_i32_181 = arith.constant 1 : i32
    %c0_i32_182 = arith.constant 0 : i32
    %c0_i32_183 = arith.constant 0 : i32
    %233 = tpu.memref_slice %arg14[%c1_i32_179, %c0_i32_182, %c0_i32_183] : memref<2x32x256xbf16, #tpu.memory_space<vmem>> -> memref<1x32x256xbf16, #tpu.memory_space<vmem>>
    %234 = tpu.memref_squeeze %233 : memref<1x32x256xbf16, #tpu.memory_space<vmem>> -> memref<32x256xbf16, #tpu.memory_space<vmem>>
    %c0_i32_184 = arith.constant 0 : i32
    %c0_i32_185 = arith.constant 0 : i32
    %235 = tpu.memref_slice %arg10[%arg0, %c3_i32_180, %c0_i32_184, %c0_i32_185] : memref<2x5x32x256xbf16, #tpu.memory_space<any>> -> memref<1x1x32x256xbf16, #tpu.memory_space<any>>
    %236 = tpu.memref_squeeze %235 : memref<1x1x32x256xbf16, #tpu.memory_space<any>> -> memref<32x256xbf16, #tpu.memory_space<any>>
    %237 = tpu.memref_slice %arg15[%c1_i32_181] : memref<2x!tpu.dma_semaphore, #tpu.memory_space<semaphore_mem>> -> memref<1x!tpu.dma_semaphore, #tpu.memory_space<semaphore_mem>>
    %238 = tpu.memref_squeeze %237 : memref<1x!tpu.dma_semaphore, #tpu.memory_space<semaphore_mem>> -> memref<!tpu.dma_semaphore, #tpu.memory_space<semaphore_mem>>
    tpu.wait_dma2 semaphore(%238 : memref<!tpu.dma_semaphore, #tpu.memory_space<semaphore_mem>>) src(%234 : memref<32x256xbf16, #tpu.memory_space<vmem>>) dst(%236 : memref<32x256xbf16, #tpu.memory_space<any>>)
    %c0_i32_186 = arith.constant 0 : i32
    %c4_i32_187 = arith.constant 4 : i32
    %c0_i32_188 = arith.constant 0 : i32
    %c0_i32_189 = arith.constant 0 : i32
    %c0_i32_190 = arith.constant 0 : i32
    %239 = tpu.memref_slice %arg14[%c0_i32_186, %c0_i32_189, %c0_i32_190] : memref<2x32x256xbf16, #tpu.memory_space<vmem>> -> memref<1x32x256xbf16, #tpu.memory_space<vmem>>
    %240 = tpu.memref_squeeze %239 : memref<1x32x256xbf16, #tpu.memory_space<vmem>> -> memref<32x256xbf16, #tpu.memory_space<vmem>>
    %c0_i32_191 = arith.constant 0 : i32
    %c0_i32_192 = arith.constant 0 : i32
    %241 = tpu.memref_slice %arg10[%arg0, %c4_i32_187, %c0_i32_191, %c0_i32_192] : memref<2x5x32x256xbf16, #tpu.memory_space<any>> -> memref<1x1x32x256xbf16, #tpu.memory_space<any>>
    %242 = tpu.memref_squeeze %241 : memref<1x1x32x256xbf16, #tpu.memory_space<any>> -> memref<32x256xbf16, #tpu.memory_space<any>>
    %243 = tpu.memref_slice %arg15[%c0_i32_188] : memref<2x!tpu.dma_semaphore, #tpu.memory_space<semaphore_mem>> -> memref<1x!tpu.dma_semaphore, #tpu.memory_space<semaphore_mem>>
    %244 = tpu.memref_squeeze %243 : memref<1x!tpu.dma_semaphore, #tpu.memory_space<semaphore_mem>> -> memref<!tpu.dma_semaphore, #tpu.memory_space<semaphore_mem>>
    tpu.wait_dma2 semaphore(%244 : memref<!tpu.dma_semaphore, #tpu.memory_space<semaphore_mem>>) src(%240 : memref<32x256xbf16, #tpu.memory_space<vmem>>) dst(%242 : memref<32x256xbf16, #tpu.memory_space<any>>)
    return
  }
  func.func @transform_0(%arg0: i32) -> (i32, i32, i32) {
    %c0_i32 = arith.constant 0 : i32
    %c0_i32_0 = arith.constant 0 : i32
    %c0_i32_1 = arith.constant 0 : i32
    return %arg0, %c0_i32, %c0_i32_0 : i32, i32, i32
  }
  func.func @transform_1(%arg0: i32) -> (i32, i32, i32) {
    %c0_i32 = arith.constant 0 : i32
    %c0_i32_0 = arith.constant 0 : i32
    %c0_i32_1 = arith.constant 0 : i32
    return %arg0, %c0_i32, %c0_i32_0 : i32, i32, i32
  }
  func.func @transform_2(%arg0: i32) -> (i32, i32, i32) {
    %c0_i32 = arith.constant 0 : i32
    %c0_i32_0 = arith.constant 0 : i32
    %c0_i32_1 = arith.constant 0 : i32
    return %arg0, %c0_i32, %c0_i32_0 : i32, i32, i32
  }
  func.func @transform_3(%arg0: i32) -> (i32, i32) {
    %c0_i32 = arith.constant 0 : i32
    %c0_i32_0 = arith.constant 0 : i32
    %c0_i32_1 = arith.constant 0 : i32
    return %c0_i32, %c0_i32_0 : i32, i32
  }
  func.func @transform_4(%arg0: i32) -> (i32, i32) {
    %c0_i32 = arith.constant 0 : i32
    %c0_i32_0 = arith.constant 0 : i32
    %c0_i32_1 = arith.constant 0 : i32
    return %c0_i32, %c0_i32_0 : i32, i32
  }
  func.func @transform_5(%arg0: i32) -> (i32, i32) {
    %c0_i32 = arith.constant 0 : i32
    %c0_i32_0 = arith.constant 0 : i32
    %c0_i32_1 = arith.constant 0 : i32
    return %c0_i32, %c0_i32_0 : i32, i32
  }
  func.func @transform_6(%arg0: i32) -> (i32, i32) {
    %c0_i32 = arith.constant 0 : i32
    %c0_i32_0 = arith.constant 0 : i32
    %c0_i32_1 = arith.constant 0 : i32
    return %c0_i32, %c0_i32_0 : i32, i32
  }
  func.func @transform_7(%arg0: i32) -> (i32, i32) {
    %c0_i32 = arith.constant 0 : i32
    %c0_i32_0 = arith.constant 0 : i32
    %c0_i32_1 = arith.constant 0 : i32
    return %c0_i32, %c0_i32_0 : i32, i32
  }
  func.func @transform_8(%arg0: i32) -> (i32, i32) {
    %c0_i32 = arith.constant 0 : i32
    %c0_i32_0 = arith.constant 0 : i32
    %c0_i32_1 = arith.constant 0 : i32
    return %c0_i32, %c0_i32_0 : i32, i32
  }
}

</mosaic_0001>

<bundles_post_ra>
// kernel: tpu_custom_call.1
= control target key start
LH: loop header
LB: loop body
LE: loop exit
PB: predicated region body
PF: predicated region fallthrough
CT: control target
= control target key end

     0   :  { %s2706_s30 = smov 0   ;;  %s3417_s0 = inlined_call_operand.vmem [shape: f32[2,32,256], index: 0, kind: input, shape index: {}]   ;;  %s3418_s1 = inlined_call_operand.vmem [shape: bf16[2,32,256], index: 1, kind: input, shape index: {}]   ;;  %s3419_s2 = inlined_call_operand.vmem [shape: f32[2,1,256], index: 2, kind: input, shape index: {}]   ;;  %s3420_s3 = inlined_call_operand.vmem [shape: bf16[64,32], index: 3, kind: input, shape index: {}]   ;;  %s3421_s4 = inlined_call_operand.vmem [shape: bf16[64,32], index: 4, kind: input, shape index: {}]   ;;  %s3422_s5 = inlined_call_operand.vmem [shape: f32[64,1], index: 5, kind: input, shape index: {}]   ;;  %s3423_s6 = inlined_call_operand.vmem [shape: f32[64,1], index: 6, kind: input, shape index: {}]   ;;  %s3424_s7 = inlined_call_operand.vmem [shape: bf16[32,64], index: 7, kind: input, shape index: {}]   ;;  %s3425_s8 = inlined_call_operand.vmem [shape: f32[32,1], index: 8, kind: input, shape index: {}]   ;;  %s3426_s9 = inlined_call_operand.hbm [shape: bf16[2,5,32,256], index: 9, kind: output, shape index: {}]  }
   0x1 LB: > { %s2712_s10 = sadd.s32 4294967295, %s2638_s30   ;;  %p2357_p0 = scmp.lt.s32.totalorder %s2638_s30, 1  ;;  %s2638_s30 = sphi %s2706_s30, %s19_s30  }
   0x3   : > { %216 = sbr.rel (%p2357_p0) target bundleno = 2031 (0x7ef), region = 56 }
   0xa   : > { %p250_p1 = scmp.lt.s32.totalorder %s2712_s10, 1  ;;  %v2640_v0 = vmov 0   ;;  %v301_v1 = vld [vmem:[%s3422_s5] sm:$0xff]  ;;  %v303_v2 = vld [vmem:[%s3422_s5 + $0x10] sm:$0xff]  ;;  %s2432_s16 = smul.u32 2560, %s2712_s10  ;;  %v302_v3 = vld [vmem:[%s3422_s5 + $0x8] sm:$0xff] }
   0xb   : > { %434 = vmatprep.mubr.bf16.mxu0 %v2640_v0  ;;  %669 = vmatprep.mubr.bf16.mxu1 %v2640_v0  ;;  %v304_v4 = vld [vmem:[%s3422_s5 + $0x18] sm:$0xff]  ;;  %s2641_s27 = smov [#allocation5]   ;;  %s2642_s29 = smov 256   ;;  %v305_v16 = vld [vmem:[%s3422_s5 + $0x20] sm:$0xff]  ;;  %v306_v17 = vld [vmem:[%s3422_s5 + $0x28] sm:$0xff]  ;;  %vm389_vm0 = vcmask 261120  }
   0xc   : > { %s2719_s11 = scalar_select %p250_p1, %s2712_s10, 1  ;;  %2458 = vset.pattern.permute.xlu1 %v2640_v0  ;;  %2457 = vset.pattern.permute.xlu0 %v2640_v0  ;;  %v289_v32 = vld [vmem:[%s3421_s4] sm:$0xff]   ;;  %v291_v34 = vld [vmem:[%s3421_s4 + $0x8] sm:$0xff]   ;;  %v307_v35 = vld [vmem:[%s3422_s5 + $0x30] sm:$0xff]  ;;  %vm844_vm1 = vcmask 523264  }
   0xd   : > { %321 = vperm.xlu1 %2458, %v303_v2   ;;  %311 = vperm.xlu0 %2457, %v301_v1   ;;  %s546_s28 = sshll.u32 %s2641_s27, 4  ;;  %550 = sst [smem:[#allocation8]] %s2642_s29  ;;  %v308_v36 = vld [vmem:[%s3422_s5 + $0x38] sm:$0xff]  ;;  %v293_v38 = vld [vmem:[%s3421_s4 + $0x10] sm:$0xff]   ;;  %s2782_s28 = int_to_ptr.vmem [resolvable:$true] %s546_s28 }
   0xe   : > { %s2430_s17 = sshll.u32 %s2719_s11, 6  ;;  %s2431_s21 = sshll.u32 %s2719_s11, 5  ;;  %v295_v39 = vld [vmem:[%s3421_s4 + $0x18] sm:$0xff]  }
   0xf   : > { %s254_s20 = scalar_lea.vmem %s3417_s0, %s2430_s17  ;;  %s2362_s26 = sshll.u32 %s2719_s11, 1 }
  0x10   : > { %v265_v5 = vld [vmem:[%s254_s20] sm:$0xff]  ;;  %v266_v6 = vld [vmem:[%s254_s20 + $0x8] sm:$0xff]  ;;  %v267_v7 = vld [vmem:[%s254_s20 + $0x10] sm:$0xff]  ;;  %s259_s11 = scalar_lea.vmem %s3418_s1, %s2431_s21  ;;  %s2769_s21 = scalar_lea.hbm %s3426_s9, %s2432_s16 }
  0x11   : > { %v268_v8 = vld [vmem:[%s254_s20 + $0x18] sm:$0xff]  ;;  %v269_v9 = vld [vmem:[%s254_s20 + $0x20] sm:$0xff]  ;;  %v270_v10 = vld [vmem:[%s254_s20 + $0x28] sm:$0xff]  ;;  %v2742_v11 = vmul.f32 0.667, %v265_v5  ;;  %326 = vperm.xlu1 %2458, %v304_v4   ;;  %316 = vperm.xlu0 %2457, %v302_v3   ;;  %s2774_s24 = scalar_lea.vmem %s3419_s2, %s2362_s26  ;;  %552 = sst [smem:[#allocation8 + $0x1]] %s2642_s29 }
  0x12   : > { %v271_v12 = vld [vmem:[%s254_s20 + $0x30] sm:$0xff]  ;;  %v272_v13 = vld [vmem:[%s254_s20 + $0x38] sm:$0xff]  ;;  %v2748_v14 = vmul.f32 0.667, %v266_v6  ;;  %v2750_v15 = vmul.f32 0.667, %v267_v7 }
  0x13   : > { %v2758_v18 = vmul.f32 0.667, %v268_v8  ;;  %v2760_v19 = vmul.f32 0.667, %v269_v9  ;;  %v2762_v20 = vmul.f32 0.667, %v270_v10 }
  0x14   : > { %v2776_v21 = vmul.f32 0.667, %v271_v12  ;;  %v2778_v22 = vmul.f32 0.667, %v272_v13  ;;  %v519_v23 = vpack.c.bf16 %v2750_v15, %v2742_v11  ;;  %v299_v24 = vld [vmem:[%s259_s11 + $0x10] sm:$0xff]  ;;  %v300_v25 = vld [vmem:[%s259_s11 + $0x18] sm:$0xff] }
  0x15   : > { %v2459_v26 = vld [vmem:[%s259_s11 + $0x4] ss:$8 sps:$4 sm:$0xff]   ;;  %v520_v27 = vpack.c.bf16 %v2758_v18, %v2748_v14  ;;  %336 = vperm.xlu1 %2458, %v306_v17   ;;  %331 = vperm.xlu0 %2457, %v305_v16   ;;  %v2461_v30 = vld [vmem:[%s259_s11] ss:$8 sps:$4 sm:$0xff]   ;;  %s2643_s10 = smov 2   ;;  %v2370_v31 = vcombine.high %v299_v24, %v300_v25  ;;  %s2644_s16 = smov 128   ;;  %v2369_v33 = vcombine.low %v299_v24, %v300_v25 }
  0x16   : > { %v521_v28 = vpack.c.bf16 %v2776_v21, %v2760_v19  ;;  %v522_v29 = vpack.c.bf16 %v2778_v22, %v2762_v20  ;;  %523 = vst [vmem:[#allocation5] sm:$0xff] %v519_v23  ;;  %554 = sst [smem:[#allocation8 + $0x2]] %s2643_s10  ;;  %402 = vmatprep.subr.bf16.mxu0 %v2459_v26  ;;  %s2645_s27 = smov 64   ;;  %v2808_v37 = vld [vmem:[%s2774_s24] sm:$0x3] }
  0x17   : > { %524 = vst [vmem:[#allocation5 + $0x8] sm:$0xff] %v520_v27  ;;  %556 = sst [smem:[#allocation8 + $0x3]] %s2644_s16  ;;  %637 = vmatprep.subr.bf16.mxu1 %v520_v27  ;;  %403 = vmatpush1.bf16.msra.mxu0 %v2461_v30  ;;  %s3430_s23 = smov 4  }
  0x18   : > { %525 = vst [vmem:[#allocation5 + $0x10] sm:$0xff] %v521_v28  ;;  %526 = vst [vmem:[#allocation5 + $0x18] sm:$0xff] %v522_v29  ;;  %558 = sst [smem:[#allocation8 + $0x4]] %s2645_s27  ;;  %638 = vmatpush1.bf16.msra.mxu1 %v519_v23  ;;  %404 = vmatprep.subr.bf16.mxu0 %v2370_v31  ;;  %s3427_s25 = smov [#allocation6]  }
  0x19   : > { %560 = sst [smem:[#allocation8 + $0x5]] %s2643_s10  ;;  %639 = vmatprep.subr.bf16.mxu1 %v522_v29  ;;  %346 = vperm.xlu1 %2458, %v308_v36   ;;  %s2648_s26 = smov [#allocation7]  }
  0x1a   : > { %562 = sst [smem:[#allocation8 + $0x6]] %s2645_s27  ;;  %341 = vperm.xlu0 %2457, %v307_v35   ;;  %s2649_s12 = smov 0  }
  0x1b   : > { %564 = sst [smem:[#allocation8 + $0x7]] %s2644_s16  ;;  %405 = vmatpush1.bf16.msra.mxu0 %v2369_v33  ;;  %s2650_s19 = smov [#allocation5 + $0x20]  }
  0x1c   : > { %566 = sst [smem:[#allocation8 + $0x8]] %s3430_s23  ;;  %640 = vmatpush1.bf16.msra.mxu1 %v521_v28  ;;  %s3001_s20 = sshll.u32 %s2650_s19, 4  ;;  %s974_s20 = int_to_ptr.vmem [resolvable:$true] %s3001_s20 }
  0x1d   : > { %568 = dma.general %s2782_s28, 512, %s2769_s21, %s3427_s25, %s2648_s26, [#allocation8], %s2649_s12, 0  }
  0x1e   : > { %977 = sst [smem:[#allocation10]] %s2642_s29  ;;  %2371 = vmatmul.mubr.msk.bf16.vlgmr.msra.gmra.mrb[0].mxu0 %vm389_vm0, %v289_v32  ;;  %v2462_v40 = vld [vmem:[%s3420_s3] sm:$0xff]   ;;  %v711_v41 = vld [vmem:[%s3423_s6 + $0x8] sm:$0xff]  ;;  %v713_v45 = vld [vmem:[%s3423_s6 + $0x18] sm:$0xff]  ;;  %s2316_s22 = scalar_lea.hbm %s2769_s21, 512 }
  0x1f   : > { %979 = sst [smem:[#allocation10 + $0x1]] %s2642_s29  ;;  %444 = vmatprep.mubr.bf16.mxu0 %v2640_v0  ;;  %2380 = vmatmul.mubr.msk.bf16.vlgmr.msra.gmra.mrb[0].mxu1 %vm389_vm0, %v2462_v40  ;;  %v710_v42 = vld [vmem:[%s3423_s6] sm:$0xff]  ;;  %v719_v43 = vmul.f32 0.001, %v711_v41  ;;  %v2463_v46 = vld [vmem:[%s3420_s3 + $0x8] sm:$0xff]   ;;  %v712_v47 = vld [vmem:[%s3423_s6 + $0x10] sm:$0xff] }
  0x20   : > { %981 = sst [smem:[#allocation10 + $0x2]] %s2643_s10  ;;  %679 = vmatprep.mubr.bf16.mxu1 %v2640_v0  ;;  %v718_v44 = vmul.f32 0.001, %v710_v42  ;;  %v721_v48 = vmul.f32 0.001, %v713_v45  ;;  %v715_v50 = vld [vmem:[%s3423_s6 + $0x28] sm:$0xff] }
  0x21   : > { %983 = sst [smem:[#allocation10 + $0x3]] %s2644_s16  ;;  %733 = vperm.xlu1 %2458, %v719_v43   ;;  %v720_v49 = vmul.f32 0.001, %v712_v47  ;;  %v714_v51 = vld [vmem:[%s3423_s6 + $0x20] sm:$0xff]  ;;  %v723_v52 = vmul.f32 0.001, %v715_v50 }
  0x22   : > { %985 = sst [smem:[#allocation10 + $0x4]] %s2645_s27  ;;  %728 = vperm.xlu0 %2457, %v718_v44   ;;  %v722_v53 = vmul.f32 0.001, %v714_v51  ;;  %v717_v54 = vld [vmem:[%s3423_s6 + $0x38] sm:$0xff]  ;;  %v2464_v55 = vld [vmem:[%s3420_s3 + $0x10] sm:$0xff]   ;;  %v811_v59 = vld [vmem:[%s3425_s8 + $0x8] sm:$0xff] }
  0x23   : > { %987 = sst [smem:[#allocation10 + $0x5]] %s2643_s10  ;;  %v716_v56 = vld [vmem:[%s3423_s6 + $0x30] sm:$0xff]  ;;  %v725_v57 = vmul.f32 0.001, %v717_v54  ;;  %v2465_v60 = vld [vmem:[%s3420_s3 + $0x18] sm:$0xff]   ;;  %v810_v61 = vld [vmem:[%s3425_s8] sm:$0xff] }
  0x24   : > { %989 = sst [smem:[#allocation10 + $0x6]] %s2645_s27  ;;  %v724_v58 = vmul.f32 0.001, %v716_v56  ;;  %v813_v62 = vld [vmem:[%s3425_s8 + $0x18] sm:$0xff]  ;;  %v812_v63 = vld [vmem:[%s3425_s8 + $0x10] sm:$0xff]  ;;  %s3429_s26 = smov [#allocation6 + $0x1]  }
  0x25   : > { %991 = sst [smem:[#allocation10 + $0x7]] %s2644_s16  ;;  %743 = vperm.xlu1 %2458, %v721_v48   ;;  %s2652_s13 = smov [#allocation9]  }
  0x26   : > { %993 = sst [smem:[#allocation10 + $0x8]] %s3430_s23  ;;  %2372 = vmatmul.mubr.msk.bf16.gmra.mrb[4].mxu0 %vm389_vm0, %v291_v34  ;;  %738 = vperm.xlu0 %2457, %v720_v49  }
  0x27   : > { %454 = vmatprep.mubr.bf16.mxu0 %v2640_v0  ;;  %2381 = vmatmul.mubr.msk.bf16.gmra.mrb[4].mxu1 %vm389_vm0, %v2463_v46 }
  0x28   : > { %689 = vmatprep.mubr.bf16.mxu1 %v2640_v0 }
  0x29   : > { %753 = vperm.xlu1 %2458, %v723_v52  }
  0x2a   : > { %748 = vperm.xlu0 %2457, %v722_v53  }
  0x2d   : > { %763 = vperm.xlu1 %2458, %v725_v57  }
  0x2e   : > { %2373 = vmatmul.mubr.msk.bf16.gmra.mrb[8].mxu0 %vm389_vm0, %v293_v38  ;;  %758 = vperm.xlu0 %2457, %v724_v58  }
  0x2f   : > { %464 = vmatprep.mubr.bf16.mxu0 %v2640_v0  ;;  %2382 = vmatmul.mubr.msk.bf16.gmra.mrb[8].mxu1 %vm389_vm0, %v2464_v55 }
  0x30   : > { %699 = vmatprep.mubr.bf16.mxu1 %v2640_v0 }
  0x31   : > { %821 = vperm.xlu1 %2458, %v811_v59  }
  0x32   : > { %816 = vperm.xlu0 %2457, %v810_v61  }
  0x35   : > { %831 = vperm.xlu1 %2458, %v813_v62  }
  0x36   : > { %2374 = vmatmul.mubr.msk.bf16.gmra.mrb[12].mxu0 %vm389_vm0, %v295_v39  ;;  %826 = vperm.xlu0 %2457, %v812_v63  }
  0x37   : > { %883 = vmatprep.mubr.bf16.mxu0 %v2640_v0  ;;  %2383 = vmatmul.mubr.msk.bf16.gmra.mrb[12].mxu1 %vm389_vm0, %v2465_v60 }
  0x38   : > { %1096 = vmatprep.mubr.bf16.mxu1 %v2640_v0 }
  0x8c   : > { %v312_v1 = vpop.permute.xlu0 %311  ;;  %v322_v2 = vpop.permute.xlu1 %321 }
  0x90   : > { %v317_v3 = vpop.permute.xlu0 %316  ;;  %v327_v4 = vpop.permute.xlu1 %326 }
  0x94   : > { %v2897_v5 = vpop.permute.xlu0 %331  ;;  %v2899_v6 = vpop.permute.xlu1 %336 }
  0x98   : > { %v2905_v16 = vpop.permute.xlu1 %346 }
  0x99   : > { %v2901_v8 = vpop.permute.xlu0 %341 }
  0xa0   : > { %v734_v38 = vpop.permute.xlu1 %733 }
  0xa1   : > { %v729_v23 = vpop.permute.xlu0 %728 }
  0xa4   : > { %v744_v60 = vpop.permute.xlu1 %743 }
  0xa5   : > { %v739_v45 = vpop.permute.xlu0 %738 }
  0xf1   : > { %v436_v7 = vpop.f32.mrb[0].mxu0 }
  0xf2   : > { %v438_v9 = vpop.f32.mrb[1].mxu0  ;;  %v2903_v13 = vadd.f32 %v436_v7, %v312_v1  ;;  %v671_v24 = vpop.f32.mrb[0].mxu1 }
  0xf3   : > { %v440_v10 = vpop.f32.mrb[2].mxu0  ;;  %v2907_v17 = vadd.f32 %v438_v9, %v312_v1  ;;  %v673_v27 = vpop.f32.mrb[1].mxu1 }
  0xf4   : > { %v442_v12 = vpop.f32.mrb[3].mxu0  ;;  %v2909_v25 = vadd.f32 %v440_v10, %v317_v3  ;;  %v672_v26 = vadd.f32 %v671_v24, %v2903_v13  ;;  %v675_v31 = vpop.f32.mrb[2].mxu1 }
  0xf5   : > { %v2912_v29 = vadd.f32 %v442_v12, %v317_v3  ;;  %v674_v30 = vadd.f32 %v673_v27, %v2907_v17  ;;  %v677_v35 = vpop.f32.mrb[3].mxu1  ;;  %v749_v9 = vpop.permute.xlu0 %748 }
  0xf6   : > { %v766_v33 = vadd.f32 %v729_v23, %v672_v26  ;;  %v676_v34 = vadd.f32 %v675_v31, %v2909_v25 }
  0xf7   : > { %v767_v39 = vadd.f32 %v729_v23, %v674_v30  ;;  %v678_v40 = vadd.f32 %v677_v35, %v2912_v29 }
  0xf8   : > { %2478 = vtanh.f32 %v766_v33  ;;  %v768_v42 = vadd.f32 %v734_v38, %v676_v34 }
  0xf9   : > { %v446_v28 = vpop.f32.mrb[4].mxu0  ;;  %2480 = vtanh.f32 %v767_v39  ;;  %v769_v43 = vadd.f32 %v734_v38, %v678_v40 }
  0xfa   : > { %v448_v32 = vpop.f32.mrb[5].mxu0  ;;  %2482 = vtanh.f32 %v768_v42  ;;  %v2917_v44 = vadd.f32 %v446_v28, %v322_v2  ;;  %v681_v47 = vpop.f32.mrb[4].mxu1 }
  0xfb   : > { %v450_v36 = vpop.f32.mrb[6].mxu0  ;;  %2484 = vtanh.f32 %v769_v43  ;;  %v2919_v46 = vadd.f32 %v448_v32, %v322_v2  ;;  %v683_v50 = vpop.f32.mrb[5].mxu1 }
  0xfc   : > { %v452_v41 = vpop.f32.mrb[7].mxu0  ;;  %v2921_v48 = vadd.f32 %v450_v36, %v327_v4  ;;  %v682_v49 = vadd.f32 %v681_v47, %v2917_v44  ;;  %v685_v54 = vpop.f32.mrb[6].mxu1 }
  0xfd   : > { %v2924_v52 = vadd.f32 %v452_v41, %v327_v4  ;;  %v684_v53 = vadd.f32 %v683_v50, %v2919_v46  ;;  %v687_v58 = vpop.f32.mrb[7].mxu1  ;;  %v754_v41 = vpop.permute.xlu1 %753 }
  0xfe   : > { %v770_v56 = vadd.f32 %v739_v45, %v682_v49  ;;  %v686_v57 = vadd.f32 %v685_v54, %v2921_v48 }
  0xff   : > { %v771_v61 = vadd.f32 %v739_v45, %v684_v53  ;;  %v688_v62 = vadd.f32 %v687_v58, %v2924_v52 }
 0x100   : > { %2486 = vtanh.f32 %v770_v56  ;;  %v772_v1 = vadd.f32 %v744_v60, %v686_v57 }
 0x101   : > { %v456_v51 = vpop.f32.mrb[8].mxu0  ;;  %2488 = vtanh.f32 %v771_v61  ;;  %v773_v2 = vadd.f32 %v744_v60, %v688_v62  ;;  %v759_v60 = vpop.permute.xlu0 %758 }
 0x102   : > { %v458_v55 = vpop.f32.mrb[9].mxu0  ;;  %v2479_v3 = vpop.eup %2478  ;;  %2490 = vtanh.f32 %v772_v1  ;;  %v2930_v4 = vadd.f32 %v456_v51, %v2897_v5 }
 0x103   : > { %v460_v59 = vpop.f32.mrb[10].mxu0  ;;  %v2481_v7 = vpop.eup %2480  ;;  %2492 = vtanh.f32 %v773_v2  ;;  %v2933_v10 = vadd.f32 %v458_v55, %v2897_v5 }
 0x104   : > { %v462_v63 = vpop.f32.mrb[11].mxu0  ;;  %v691_v12 = vpop.f32.mrb[8].mxu1  ;;  %v2936_v24 = vadd.f32 %v460_v59, %v2899_v6 }
 0x105   : > { %v2483_v23 = vpop.eup %2482  ;;  %v692_v26 = vadd.f32 %v691_v12, %v2930_v4  ;;  %v693_v27 = vpop.f32.mrb[9].mxu1  ;;  %v2940_v31 = vadd.f32 %v462_v63, %v2899_v6 }
 0x106   : > { %v2485_v30 = vpop.eup %2484  ;;  %v694_v32 = vadd.f32 %v693_v27, %v2933_v10  ;;  %v695_v33 = vpop.f32.mrb[10].mxu1  ;;  %v802_v35 = vpack.c.bf16 %v2483_v23, %v2479_v3 }
 0x107   : > { %v774_v5 = vadd.f32 %v749_v9, %v692_v26  ;;  %v696_v36 = vadd.f32 %v695_v33, %v2936_v24  ;;  %v697_v38 = vpop.f32.mrb[11].mxu1  ;;  %v803_v40 = vpack.c.bf16 %v2485_v30, %v2481_v7 }
 0x108   : > { %v775_v42 = vadd.f32 %v749_v9, %v694_v32  ;;  %v698_v43 = vadd.f32 %v697_v38, %v2940_v31  ;;  %v764_v9 = vpop.permute.xlu1 %763 }
 0x109   : > { %v466_v28 = vpop.f32.mrb[12].mxu0  ;;  %2494 = vtanh.f32 %v774_v5  ;;  %v776_v47 = vadd.f32 %v754_v41, %v696_v36  ;;  %851 = vmatprep.subr.bf16.mxu0 %v803_v40 }
 0x10a   : > { %v468_v34 = vpop.f32.mrb[13].mxu0  ;;  %2496 = vtanh.f32 %v775_v42  ;;  %v777_v6 = vadd.f32 %v754_v41, %v698_v43  ;;  %852 = vmatpush1.bf16.msra.mxu0 %v802_v35  ;;  %v2487_v49 = vpop.eup %2486  ;;  %v2946_v50 = vadd.f32 %v466_v28, %v2901_v8  ;;  %v2466_v41 = vld [vmem:[%s3424_s7] sm:$0xff]   ;;  %v2467_v42 = vld [vmem:[%s3424_s7 + $0x8] sm:$0xff]   ;;  %v493_v43 = vlaneseq }
 0x10b   : > { %v470_v39 = vpop.f32.mrb[14].mxu0  ;;  %2498 = vtanh.f32 %v776_v47  ;;  %v2489_v51 = vpop.eup %2488  ;;  %v2949_v53 = vadd.f32 %v468_v34, %v2901_v8 }
 0x10c   : > { %v472_v45 = vpop.f32.mrb[15].mxu0  ;;  %2500 = vtanh.f32 %v777_v6  ;;  %v701_v54 = vpop.f32.mrb[12].mxu1  ;;  %v2952_v56 = vadd.f32 %v470_v39, %v2905_v16 }
 0x10d   : > { %v2491_v55 = vpop.eup %2490  ;;  %v702_v57 = vadd.f32 %v701_v54, %v2946_v50  ;;  %v703_v58 = vpop.f32.mrb[13].mxu1  ;;  %v2956_v61 = vadd.f32 %v472_v45, %v2905_v16  ;;  %v494_v45 = vshrl.u32 %v493_v43, 7 }
 0x10e   : > { %v2493_v59 = vpop.eup %2492  ;;  %v704_v62 = vadd.f32 %v703_v58, %v2949_v53  ;;  %v705_v63 = vpop.f32.mrb[14].mxu1  ;;  %v804_v1 = vpack.c.bf16 %v2491_v55, %v2487_v49 }
 0x10f   : > { %v778_v2 = vadd.f32 %v759_v60, %v702_v57  ;;  %v706_v8 = vadd.f32 %v705_v63, %v2952_v56  ;;  %v707_v3 = vpop.f32.mrb[15].mxu1  ;;  %v805_v7 = vpack.c.bf16 %v2493_v59, %v2489_v51  ;;  %v495_v47 = vsub.s32 0, %v494_v45  ;;  %v817_v54 = vpop.permute.xlu0 %816 }
 0x110   : > { %v779_v12 = vadd.f32 %v759_v60, %v704_v62  ;;  %v708_v23 = vadd.f32 %v707_v3, %v2956_v61  ;;  %v499_v6 = vsub.s32 1, %v494_v45  ;;  %v822_v59 = vpop.permute.xlu1 %821 }
 0x111   : > { %2502 = vtanh.f32 %v778_v2  ;;  %v780_v26 = vadd.f32 %v764_v9, %v706_v8  ;;  %853 = vmatprep.subr.bf16.mxu0 %v805_v7  ;;  %v2972_v49 = vrot.slane %v2808_v37, %v495_v47 }
 0x112   : > { %2504 = vtanh.f32 %v779_v12  ;;  %v781_v27 = vadd.f32 %v764_v9, %v708_v23  ;;  %854 = vmatpush1.bf16.msra.mxu0 %v804_v1  ;;  %v2975_v51 = vrot.slane %v2808_v37, %v499_v6 }
 0x113   : > { %v2495_v16 = vpop.eup %2494  ;;  %2506 = vtanh.f32 %v780_v26  ;;  %v827_v23 = vpop.permute.xlu0 %826 }
 0x114   : > { %v2497_v28 = vpop.eup %2496  ;;  %2508 = vtanh.f32 %v781_v27 }
 0x115   : > { %v2499_v30 = vpop.eup %2498 }
 0x116   : > { %v2501_v32 = vpop.eup %2500  ;;  %v806_v33 = vpack.c.bf16 %v2499_v30, %v2495_v16 }
 0x117   : > { %v807_v34 = vpack.c.bf16 %v2501_v32, %v2497_v28 }
 0x119   : > { %855 = vmatprep.subr.bf16.mxu0 %v807_v34 }
 0x11a   : > { %856 = vmatpush1.bf16.msra.mxu0 %v806_v33  ;;  %v832_v33 = vpop.permute.xlu1 %831 }
 0x11b   : > { %v2503_v35 = vpop.eup %2502 }
 0x11c   : > { %v2505_v5 = vpop.eup %2504 }
 0x11d   : > { %v2507_v36 = vpop.eup %2506 }
 0x11e   : > { %v2509_v38 = vpop.eup %2508  ;;  %v808_v39 = vpack.c.bf16 %v2507_v36, %v2503_v35 }
 0x11f   : > { %v809_v40 = vpack.c.bf16 %v2509_v38, %v2505_v5 }
 0x121   : > { %857 = vmatprep.subr.bf16.mxu0 %v809_v40 }
 0x122   : > { %858 = vmatpush1.bf16.msra.mxu0 %v808_v39 }
 0x125   : > { %2386 = vmatmul.mubr.msk.bf16.vlgmr.msra.gmra.mrb[16].mxu0 %vm844_vm1, %v2466_v41 }
 0x126   : > { %893 = vmatprep.mubr.bf16.mxu0 %v2640_v0 }
 0x12d   : > { %2387 = vmatmul.mubr.msk.bf16.gmra.mrb[20].mxu0 %vm844_vm1, %v2467_v42 }
 0x12e   : > { %1309 = vmatprep.mubr.bf16.mxu0 %v2640_v0 }
 0x1f8   : > { %v885_v55 = vpop.f32.mrb[16].mxu0 }
 0x1f9   : > { %v886_v57 = vadd.f32 %v885_v55, %v817_v54  ;;  %v887_v58 = vpop.f32.mrb[17].mxu0 }
 0x1fa   : > { %v888_v60 = vadd.f32 %v887_v58, %v817_v54  ;;  %v889_v62 = vpop.f32.mrb[18].mxu0 }
 0x1fb   : > { %v912_v63 = vmul.f32 %v886_v57, %v2972_v49  ;;  %v890_v1 = vadd.f32 %v889_v62, %v822_v59  ;;  %v891_v2 = vpop.f32.mrb[19].mxu0 }
 0x1fc   : > { %v913_v8 = vmul.f32 %v888_v60, %v2975_v51  ;;  %v892_v3 = vadd.f32 %v891_v2, %v822_v59 }
 0x1fd   : > { %v914_v7 = vmul.f32 %v890_v1, %v2972_v49  ;;  %v2982_v37 = vadd.f32 %v912_v63, %v2742_v11 }
 0x1fe   : > { %v915_v9 = vmul.f32 %v892_v3, %v2975_v51  ;;  %v2988_v26 = vadd.f32 %v913_v8, %v2748_v14 }
 0x1ff   : > { %v2985_v12 = vadd.f32 %v914_v7, %v2750_v15 }
 0x200   : > { %v2991_v27 = vadd.f32 %v915_v9, %v2758_v18  ;;  %v895_v16 = vpop.f32.mrb[20].mxu0 }
 0x201   : > { %v944_v28 = vpack.c.bf16 %v2985_v12, %v2982_v37  ;;  %v896_v30 = vadd.f32 %v895_v16, %v827_v23  ;;  %v897_v32 = vpop.f32.mrb[21].mxu0 }
 0x202   : > { %v898_v34 = vadd.f32 %v897_v32, %v827_v23  ;;  %v899_v11 = vpop.f32.mrb[22].mxu0  ;;  %v945_v15 = vpack.c.bf16 %v2991_v27, %v2988_v26 }
 0x203   : > { %949 = vst [vmem:[#allocation5 + $0x20] sm:$0xff] %v944_v28  ;;  %v916_v35 = vmul.f32 %v896_v30, %v2972_v49  ;;  %v900_v14 = vadd.f32 %v899_v11, %v832_v33  ;;  %v901_v5 = vpop.f32.mrb[23].mxu0 }
 0x204   : > { %v917_v18 = vmul.f32 %v898_v34, %v2975_v51  ;;  %v902_v36 = vadd.f32 %v901_v5, %v832_v33  ;;  %950 = vst [vmem:[#allocation5 + $0x28] sm:$0xff] %v945_v15  ;;  %1064 = vmatprep.subr.bf16.mxu1 %v945_v15 }
 0x205   : > { %v918_v38 = vmul.f32 %v900_v14, %v2972_v49  ;;  %1065 = vmatpush1.bf16.msra.mxu1 %v944_v28  ;;  %v3004_v40 = vadd.f32 %v916_v35, %v2760_v19 }
 0x206   : > { %v919_v39 = vmul.f32 %v902_v36, %v2975_v51  ;;  %v3010_v42 = vadd.f32 %v917_v18, %v2762_v20 }
 0x207   : > { %v3007_v41 = vadd.f32 %v918_v38, %v2776_v21 }
 0x208   : > { %v3013_v43 = vadd.f32 %v919_v39, %v2778_v22 }
 0x209   : > { %v946_v45 = vpack.c.bf16 %v3007_v41, %v3004_v40 }
 0x20a   : > { %v947_v47 = vpack.c.bf16 %v3013_v43, %v3010_v42 }
 0x20b   : > { %951 = vst [vmem:[#allocation5 + $0x30] sm:$0xff] %v946_v45 }
 0x20c   : > { %952 = vst [vmem:[#allocation5 + $0x38] sm:$0xff] %v947_v47  ;;  %1066 = vmatprep.subr.bf16.mxu1 %v947_v47 }
 0x20d   : > { %995 = dma.general %s974_s20, 512, %s2316_s22, %s3429_s26, %s2652_s13, [#allocation10], %s2649_s12, 0   ;;  %1067 = vmatpush1.bf16.msra.mxu1 %v946_v45 }
 0x20e   : > { %v1138_v19 = vld [vmem:[%s3423_s6 + $0x8] sm:$0xff]  ;;  %v1137_v20 = vld [vmem:[%s3423_s6] sm:$0xff]  ;;  %v1140_v54 = vld [vmem:[%s3423_s6 + $0x18] sm:$0xff] }
 0x20f   : > { %v1146_v21 = vmul.f32 0.25075, %v1138_v19  ;;  %v1145_v22 = vmul.f32 0.25075, %v1137_v20  ;;  %v2468_v6 = vld [vmem:[%s3420_s3] sm:$0xff]   ;;  %v1139_v55 = vld [vmem:[%s3423_s6 + $0x10] sm:$0xff] }
 0x210   : > { %v1148_v57 = vmul.f32 0.25075, %v1140_v54  ;;  %v1147_v58 = vmul.f32 0.25075, %v1139_v55  ;;  %v1142_v59 = vld [vmem:[%s3423_s6 + $0x28] sm:$0xff]  ;;  %2393 = vmatmul.mubr.msk.bf16.vlgmr.msra.gmra.mrb[16].mxu1 %vm389_vm0, %v2468_v6  ;;  %v1141_v60 = vld [vmem:[%s3423_s6 + $0x20] sm:$0xff] }
 0x211   : > { %1160 = vperm.xlu1 %2458, %v1146_v21   ;;  %1155 = vperm.xlu0 %2457, %v1145_v22   ;;  %v1150_v62 = vmul.f32 0.25075, %v1142_v59  ;;  %v1149_v63 = vmul.f32 0.25075, %v1141_v60  ;;  %v2469_v1 = vld [vmem:[%s3420_s3 + $0x8] sm:$0xff]   ;;  %v1144_v2 = vld [vmem:[%s3423_s6 + $0x38] sm:$0xff] }
 0x212   : > { %1106 = vmatprep.mubr.bf16.mxu1 %v2640_v0  ;;  %v1143_v8 = vld [vmem:[%s3423_s6 + $0x30] sm:$0xff]  ;;  %v1152_v3 = vmul.f32 0.25075, %v1144_v2  ;;  %v1238_v9 = vld [vmem:[%s3425_s8 + $0x8] sm:$0xff]  ;;  %v1237_v23 = vld [vmem:[%s3425_s8] sm:$0xff] }
 0x213   : > { %v1151_v7 = vmul.f32 0.25075, %v1143_v8  ;;  %v2470_v16 = vld [vmem:[%s3420_s3 + $0x10] sm:$0xff]   ;;  %v1240_v28 = vld [vmem:[%s3425_s8 + $0x18] sm:$0xff] }
 0x214   : > { %v1239_v30 = vld [vmem:[%s3425_s8 + $0x10] sm:$0xff]  ;;  %v2471_v32 = vld [vmem:[%s3420_s3 + $0x18] sm:$0xff]  }
 0x215   : > { %1170 = vperm.xlu1 %2458, %v1148_v57   ;;  %1165 = vperm.xlu0 %2457, %v1147_v58  }
 0x218   : > { %2394 = vmatmul.mubr.msk.bf16.gmra.mrb[20].mxu1 %vm389_vm0, %v2469_v1 }
 0x219   : > { %1180 = vperm.xlu1 %2458, %v1150_v62   ;;  %1175 = vperm.xlu0 %2457, %v1149_v63  }
 0x21a   : > { %1116 = vmatprep.mubr.bf16.mxu1 %v2640_v0 }
 0x21d   : > { %1190 = vperm.xlu1 %2458, %v1152_v3   ;;  %1185 = vperm.xlu0 %2457, %v1151_v7  }
 0x220   : > { %2395 = vmatmul.mubr.msk.bf16.gmra.mrb[24].mxu1 %vm389_vm0, %v2470_v16 }
 0x221   : > { %1248 = vperm.xlu1 %2458, %v1238_v9   ;;  %1243 = vperm.xlu0 %2457, %v1237_v23  }
 0x222   : > { %1126 = vmatprep.mubr.bf16.mxu1 %v2640_v0 }
 0x225   : > { %1258 = vperm.xlu1 %2458, %v1240_v28   ;;  %1253 = vperm.xlu0 %2457, %v1239_v30  }
 0x228   : > { %2396 = vmatmul.mubr.msk.bf16.gmra.mrb[28].mxu1 %vm389_vm0, %v2471_v32 }
 0x290   : > { %v1156_v15 = vpop.permute.xlu0 %1155  ;;  %v1161_v38 = vpop.permute.xlu1 %1160 }
 0x294   : > { %v1166_v6 = vpop.permute.xlu0 %1165  ;;  %v1171_v60 = vpop.permute.xlu1 %1170 }
 0x298   : > { %v1176_v30 = vpop.permute.xlu0 %1175 }
 0x2e3   : > { %v1098_v33 = vpop.f32.mrb[16].mxu1 }
 0x2e4   : > { %v1099_v34 = vadd.f32 %v1098_v33, %v2903_v13  ;;  %v1100_v11 = vpop.f32.mrb[17].mxu1 }
 0x2e5   : > { %v1101_v35 = vadd.f32 %v1100_v11, %v2907_v17  ;;  %v1102_v14 = vpop.f32.mrb[18].mxu1 }
 0x2e6   : > { %v1193_v5 = vadd.f32 %v1156_v15, %v1099_v34  ;;  %v1103_v18 = vadd.f32 %v1102_v14, %v2909_v25  ;;  %v1104_v36 = vpop.f32.mrb[19].mxu1 }
 0x2e7   : > { %v1194_v39 = vadd.f32 %v1156_v15, %v1101_v35  ;;  %v1105_v45 = vadd.f32 %v1104_v36, %v2912_v29 }
 0x2e8   : > { %2510 = vtanh.f32 %v1193_v5  ;;  %v1195_v47 = vadd.f32 %v1161_v38, %v1103_v18  ;;  %v1181_v5 = vpop.permute.xlu1 %1180 }
 0x2e9   : > { %2512 = vtanh.f32 %v1194_v39  ;;  %v1196_v19 = vadd.f32 %v1161_v38, %v1105_v45 }
 0x2ea   : > { %2514 = vtanh.f32 %v1195_v47 }
 0x2eb   : > { %2516 = vtanh.f32 %v1196_v19  ;;  %v1108_v20 = vpop.f32.mrb[20].mxu1 }
 0x2ec   : > { %v1109_v21 = vadd.f32 %v1108_v20, %v2917_v44  ;;  %v1110_v22 = vpop.f32.mrb[21].mxu1 }
 0x2ed   : > { %v1111_v54 = vadd.f32 %v1110_v22, %v2919_v46  ;;  %v1112_v55 = vpop.f32.mrb[22].mxu1 }
 0x2ee   : > { %v1197_v57 = vadd.f32 %v1166_v6, %v1109_v21  ;;  %v1113_v58 = vadd.f32 %v1112_v55, %v2921_v48  ;;  %v1114_v59 = vpop.f32.mrb[23].mxu1 }
 0x2ef   : > { %v1198_v62 = vadd.f32 %v1166_v6, %v1111_v54  ;;  %v1115_v63 = vadd.f32 %v1114_v59, %v2924_v52  ;;  %v1186_v54 = vpop.permute.xlu0 %1185 }
 0x2f0   : > { %2518 = vtanh.f32 %v1197_v57  ;;  %v1199_v1 = vadd.f32 %v1171_v60, %v1113_v58 }
 0x2f1   : > { %2520 = vtanh.f32 %v1198_v62  ;;  %v1200_v2 = vadd.f32 %v1171_v60, %v1115_v63 }
 0x2f2   : > { %v2511_v8 = vpop.eup %2510  ;;  %2522 = vtanh.f32 %v1199_v1  ;;  %v1191_v1 = vpop.permute.xlu1 %1190 }
 0x2f3   : > { %v2513_v3 = vpop.eup %2512  ;;  %2524 = vtanh.f32 %v1200_v2  ;;  %v1118_v7 = vpop.f32.mrb[24].mxu1 }
 0x2f4   : > { %v2515_v9 = vpop.eup %2514  ;;  %v1119_v23 = vadd.f32 %v1118_v7, %v2930_v4  ;;  %v1120_v16 = vpop.f32.mrb[25].mxu1 }
 0x2f5   : > { %v2517_v28 = vpop.eup %2516  ;;  %v1121_v32 = vadd.f32 %v1120_v16, %v2933_v10  ;;  %v1122_v33 = vpop.f32.mrb[26].mxu1  ;;  %v1229_v34 = vpack.c.bf16 %v2515_v9, %v2511_v8 }
 0x2f6   : > { %v1201_v11 = vadd.f32 %v1176_v30, %v1119_v23  ;;  %v1123_v15 = vadd.f32 %v1122_v33, %v2936_v24  ;;  %v1124_v35 = vpop.f32.mrb[27].mxu1  ;;  %v1230_v14 = vpack.c.bf16 %v2517_v28, %v2513_v3 }
 0x2f7   : > { %v1202_v18 = vadd.f32 %v1176_v30, %v1121_v32  ;;  %v1125_v36 = vadd.f32 %v1124_v35, %v2940_v31 }
 0x2f8   : > { %2526 = vtanh.f32 %v1201_v11  ;;  %v1203_v38 = vadd.f32 %v1181_v5, %v1123_v15  ;;  %1277 = vmatprep.subr.bf16.mxu0 %v1230_v14 }
 0x2f9   : > { %2528 = vtanh.f32 %v1202_v18  ;;  %v1204_v39 = vadd.f32 %v1181_v5, %v1125_v36  ;;  %1278 = vmatpush1.bf16.msra.mxu0 %v1229_v34  ;;  %v2472_v5 = vld [vmem:[%s3424_s7] sm:$0xff]   ;;  %v2473_v18 = vld [vmem:[%s3424_s7 + $0x8] sm:$0xff]   ;;  %v1244_v36 = vpop.permute.xlu0 %1243 }
 0x2fa   : > { %v2519_v45 = vpop.eup %2518  ;;  %2530 = vtanh.f32 %v1203_v38 }
 0x2fb   : > { %v2521_v47 = vpop.eup %2520  ;;  %2532 = vtanh.f32 %v1204_v39  ;;  %v1128_v19 = vpop.f32.mrb[28].mxu1 }
 0x2fc   : > { %v2523_v20 = vpop.eup %2522  ;;  %v1129_v21 = vadd.f32 %v1128_v19, %v2946_v50  ;;  %v1130_v22 = vpop.f32.mrb[29].mxu1 }
 0x2fd   : > { %v2525_v6 = vpop.eup %2524  ;;  %v1131_v55 = vadd.f32 %v1130_v22, %v2949_v53  ;;  %v1132_v57 = vpop.f32.mrb[30].mxu1  ;;  %v1231_v58 = vpack.c.bf16 %v2523_v20, %v2519_v45 }
 0x2fe   : > { %v1205_v59 = vadd.f32 %v1186_v54, %v1129_v21  ;;  %v1133_v60 = vadd.f32 %v1132_v57, %v2952_v56  ;;  %v1134_v62 = vpop.f32.mrb[31].mxu1  ;;  %v1232_v63 = vpack.c.bf16 %v2525_v6, %v2521_v47  ;;  %v1249_v47 = vpop.permute.xlu1 %1248 }
 0x2ff   : > { %v1206_v2 = vadd.f32 %v1186_v54, %v1131_v55  ;;  %v1135_v8 = vadd.f32 %v1134_v62, %v2956_v61 }
 0x300   : > { %2534 = vtanh.f32 %v1205_v59  ;;  %v1207_v3 = vadd.f32 %v1191_v1, %v1133_v60  ;;  %1279 = vmatprep.subr.bf16.mxu0 %v1232_v63  ;;  %v1254_v63 = vpop.permute.xlu0 %1253 }
 0x301   : > { %2536 = vtanh.f32 %v1206_v2  ;;  %v1208_v7 = vadd.f32 %v1191_v1, %v1135_v8  ;;  %1280 = vmatpush1.bf16.msra.mxu0 %v1231_v58 }
 0x302   : > { %v2527_v9 = vpop.eup %2526  ;;  %2538 = vtanh.f32 %v1207_v3 }
 0x303   : > { %v2529_v23 = vpop.eup %2528  ;;  %2540 = vtanh.f32 %v1208_v7  ;;  %v1259_v7 = vpop.permute.xlu1 %1258 }
 0x304   : > { %v2531_v16 = vpop.eup %2530 }
 0x305   : > { %v2533_v28 = vpop.eup %2532  ;;  %v1233_v30 = vpack.c.bf16 %v2531_v16, %v2527_v9 }
 0x306   : > { %v1234_v32 = vpack.c.bf16 %v2533_v28, %v2529_v23 }
 0x308   : > { %1281 = vmatprep.subr.bf16.mxu0 %v1234_v32 }
 0x309   : > { %1282 = vmatpush1.bf16.msra.mxu0 %v1233_v30 }
 0x30a   : > { %v2535_v33 = vpop.eup %2534 }
 0x30b   : > { %v2537_v34 = vpop.eup %2536 }
 0x30c   : > { %v2539_v11 = vpop.eup %2538 }
 0x30d   : > { %v2541_v15 = vpop.eup %2540  ;;  %v1235_v35 = vpack.c.bf16 %v2539_v11, %v2535_v33 }
 0x30e   : > { %v1236_v14 = vpack.c.bf16 %v2541_v15, %v2537_v34 }
 0x310   : > { %1283 = vmatprep.subr.bf16.mxu0 %v1236_v14 }
 0x311   : > { %1284 = vmatpush1.bf16.msra.mxu0 %v1235_v35 }
 0x314   : > { %2399 = vmatmul.mubr.msk.bf16.vlgmr.msra.gmra.mrb[24].mxu0 %vm844_vm1, %v2472_v5 }
 0x315   : > { %1319 = vmatprep.mubr.bf16.mxu0 %v2640_v0 }
 0x31c   : > { %2400 = vmatmul.mubr.msk.bf16.gmra.mrb[28].mxu0 %vm844_vm1, %v2473_v18 }
 0x3e7   : > { %v1311_v38 = vpop.f32.mrb[24].mxu0 }
 0x3e8   : > { %v1312_v39 = vadd.f32 %v1311_v38, %v1244_v36  ;;  %v1313_v45 = vpop.f32.mrb[25].mxu0 }
 0x3e9   : > { %v1314_v19 = vadd.f32 %v1313_v45, %v1244_v36  ;;  %v1315_v20 = vpop.f32.mrb[26].mxu0 }
 0x3ea   : > { %v1338_v21 = vmul.f32 %v1312_v39, %v2972_v49  ;;  %v1316_v22 = vadd.f32 %v1315_v20, %v1249_v47  ;;  %v1317_v6 = vpop.f32.mrb[27].mxu0 }
 0x3eb   : > { %v1339_v54 = vmul.f32 %v1314_v19, %v2975_v51  ;;  %v1318_v55 = vadd.f32 %v1317_v6, %v1249_v47 }
 0x3ec   : > { %v3108_v57 = vadd.f32 %v1338_v21, %v2982_v37  ;;  %v1340_v58 = vmul.f32 %v1316_v22, %v2972_v49 }
 0x3ed   : > { %v3112_v59 = vadd.f32 %v1339_v54, %v2988_v26  ;;  %v1341_v60 = vmul.f32 %v1318_v55, %v2975_v51 }
 0x3ee   : > { %v3116_v62 = vadd.f32 %v1340_v58, %v2985_v12 }
 0x3ef   : > { %v3119_v1 = vadd.f32 %v1341_v60, %v2991_v27  ;;  %v1321_v2 = vpop.f32.mrb[28].mxu0 }
 0x3f0   : > { %v1322_v8 = vadd.f32 %v1321_v2, %v1254_v63  ;;  %v1323_v3 = vpop.f32.mrb[29].mxu0 }
 0x3f1   : > { %v1324_v37 = vadd.f32 %v1323_v3, %v1254_v63  ;;  %v1325_v9 = vpop.f32.mrb[30].mxu0 }
 0x3f2   : > { %v1342_v23 = vmul.f32 %v1322_v8, %v2972_v49  ;;  %v1326_v16 = vadd.f32 %v1325_v9, %v1259_v7  ;;  %v1327_v26 = vpop.f32.mrb[31].mxu0 }
 0x3f3   : > { %v1343_v28 = vmul.f32 %v1324_v37, %v2975_v51  ;;  %v1328_v30 = vadd.f32 %v1327_v26, %v1259_v7 }
 0x3f4   : > { %v3124_v12 = vadd.f32 %v1342_v23, %v3004_v40  ;;  %v1344_v32 = vmul.f32 %v1326_v16, %v2972_v49 }
 0x3f5   : > { %v3128_v27 = vadd.f32 %v1343_v28, %v3010_v42  ;;  %v1345_v33 = vmul.f32 %v1328_v30, %v2975_v51 }
 0x3f6   : > { %v3132_v34 = vadd.f32 %v1344_v32, %v3007_v41 }
 0x3f7   : > { %v3135_v11 = vadd.f32 %v1345_v33, %v3013_v43 }
 0x3f8   : > { %2626 = dma.done.wait [#allocation6], 512 }
 0x3f9   : > { %2627 = vsyncadd [#allocation6], 4294966784  ;;  %v1377_v15 = vpack.c.bf16 %v3116_v62, %v3108_v57  ;;  %v1378_v40 = vpack.c.bf16 %v3119_v1, %v3112_v59  ;;  %v1379_v42 = vpack.c.bf16 %v3132_v34, %v3124_v12  ;;  %v1380_v35 = vpack.c.bf16 %v3135_v11, %v3128_v27  ;;  %1524 = vmatprep.mubr.bf16.mxu0 %v2640_v0  ;;  %1405 = sst [smem:[#allocation12]] %s2642_s29  ;;  %s2653_s18 = smov [#allocation11]  }
 0x3fa   : > { %2542 = vset.pattern.permute.xlu0 %v2640_v0  ;;  %2543 = vset.pattern.permute.xlu1 %v2640_v0  ;;  %1407 = sst [smem:[#allocation12 + $0x1]] %s2642_s29  ;;  %s3431_s19 = smov [#allocation6]  }
 0x3fb   : > { %1381 = vst [vmem:[#allocation5] sm:$0xff] %v1377_v15  ;;  %1382 = vst [vmem:[#allocation5 + $0x8] sm:$0xff] %v1378_v40  ;;  %1492 = vmatprep.subr.bf16.mxu0 %v1378_v40  ;;  %1737 = vmatprep.mubr.bf16.mxu1 %v2640_v0  ;;  %1409 = sst [smem:[#allocation12 + $0x2]] %s2643_s10  ;;  %s3432_s22 = scalar_lea.hbm %s2769_s21, 1024 }
 0x3fc   : > { %1383 = vst [vmem:[#allocation5 + $0x10] sm:$0xff] %v1379_v42  ;;  %1384 = vst [vmem:[#allocation5 + $0x18] sm:$0xff] %v1380_v35  ;;  %1493 = vmatpush1.bf16.msra.mxu0 %v1377_v15  ;;  %1411 = sst [smem:[#allocation12 + $0x3]] %s2644_s16  ;;  %s2324_s24 = scalar_lea.hbm %s2769_s21, 1536 }
 0x3fd   : > { %1494 = vmatprep.subr.bf16.mxu0 %v1380_v35  ;;  %1413 = sst [smem:[#allocation12 + $0x4]] %s2645_s27 }
 0x3fe   : > { %1415 = sst [smem:[#allocation12 + $0x5]] %s2643_s10 }
 0x3ff   : > { %1417 = sst [smem:[#allocation12 + $0x6]] %s2645_s27 }
 0x400   : > { %1495 = vmatpush1.bf16.msra.mxu0 %v1379_v42  ;;  %1419 = sst [smem:[#allocation12 + $0x7]] %s2644_s16 }
 0x401   : > { %1421 = sst [smem:[#allocation12 + $0x8]] %s3430_s23 }
 0x402   : > { %1423 = dma.general %s2782_s28, 512, %s3432_s22, %s3431_s19, %s2653_s18, [#allocation12], %s2649_s12, 0  }
 0x403   : > { %v2544_v41 = vld [vmem:[%s3420_s3] sm:$0xff]   ;;  %v1567_v14 = vld [vmem:[%s3423_s6 + $0x10] sm:$0xff]  ;;  %v1566_v5 = vld [vmem:[%s3423_s6 + $0x8] sm:$0xff] }
 0x404   : > { %2406 = vmatmul.mubr.msk.bf16.vlgmr.msra.gmra.mrb[32].mxu0 %vm389_vm0, %v2544_v41  ;;  %v1565_v43 = vld [vmem:[%s3423_s6] sm:$0xff]  ;;  %v1575_v36 = vmul.f32 0.5005, %v1567_v14  ;;  %v2545_v38 = vld [vmem:[%s3420_s3 + $0x8] sm:$0xff]   ;;  %v1568_v39 = vld [vmem:[%s3423_s6 + $0x18] sm:$0xff] }
 0x405   : > { %1534 = vmatprep.mubr.bf16.mxu0 %v2640_v0  ;;  %v1573_v18 = vmul.f32 0.5005, %v1565_v43  ;;  %v1574_v45 = vmul.f32 0.5005, %v1566_v5  ;;  %v1576_v47 = vmul.f32 0.5005, %v1568_v39 }
 0x406   : > { %1593 = vperm.xlu1 %2543, %v1575_v36   ;;  %v1569_v19 = vld [vmem:[%s3423_s6 + $0x20] sm:$0xff]  ;;  %v1570_v20 = vld [vmem:[%s3423_s6 + $0x28] sm:$0xff]  ;;  %v1571_v6 = vld [vmem:[%s3423_s6 + $0x30] sm:$0xff] }
 0x407   : > { %1583 = vperm.xlu0 %2542, %v1573_v18   ;;  %v1577_v21 = vmul.f32 0.5005, %v1569_v19  ;;  %v1578_v22 = vmul.f32 0.5005, %v1570_v20  ;;  %v1572_v54 = vld [vmem:[%s3423_s6 + $0x38] sm:$0xff]  ;;  %v2546_v55 = vld [vmem:[%s3420_s3 + $0x10] sm:$0xff]  }
 0x408   : > { %v1579_v58 = vmul.f32 0.5005, %v1571_v6  ;;  %v1580_v60 = vmul.f32 0.5005, %v1572_v54  ;;  %v1665_v63 = vld [vmem:[%s3425_s8] sm:$0xff]  ;;  %v1666_v2 = vld [vmem:[%s3425_s8 + $0x8] sm:$0xff] }
 0x409   : > { %v2547_v8 = vld [vmem:[%s3420_s3 + $0x18] sm:$0xff]   ;;  %v1667_v3 = vld [vmem:[%s3425_s8 + $0x10] sm:$0xff] }
 0x40a   : > { %1598 = vperm.xlu1 %2543, %v1576_v47   ;;  %v1668_v7 = vld [vmem:[%s3425_s8 + $0x18] sm:$0xff] }
 0x40b   : > { %1588 = vperm.xlu0 %2542, %v1574_v45  }
 0x40c   : > { %2407 = vmatmul.mubr.msk.bf16.gmra.mrb[36].mxu0 %vm389_vm0, %v2545_v38 }
 0x40d   : > { %1544 = vmatprep.mubr.bf16.mxu0 %v2640_v0 }
 0x40e   : > { %1608 = vperm.xlu1 %2543, %v1578_v22  }
 0x40f   : > { %1603 = vperm.xlu0 %2542, %v1577_v21  }
 0x412   : > { %1618 = vperm.xlu1 %2543, %v1580_v60  }
 0x413   : > { %1613 = vperm.xlu0 %2542, %v1579_v58  }
 0x414   : > { %2408 = vmatmul.mubr.msk.bf16.gmra.mrb[40].mxu0 %vm389_vm0, %v2546_v55 }
 0x415   : > { %1554 = vmatprep.mubr.bf16.mxu0 %v2640_v0 }
 0x416   : > { %1676 = vperm.xlu1 %2543, %v1666_v2  }
 0x417   : > { %1671 = vperm.xlu0 %2542, %v1665_v63  }
 0x41a   : > { %1686 = vperm.xlu1 %2543, %v1668_v7  }
 0x41b   : > { %1681 = vperm.xlu0 %2542, %v1667_v3  }
 0x41c   : > { %2409 = vmatmul.mubr.msk.bf16.gmra.mrb[44].mxu0 %vm389_vm0, %v2547_v8 }
 0x485   : > { %v1594_v41 = vpop.permute.xlu1 %1593 }
 0x486   : > { %v1584_v37 = vpop.permute.xlu0 %1583 }
 0x489   : > { %v1599_v19 = vpop.permute.xlu1 %1598 }
 0x48a   : > { %v1589_v15 = vpop.permute.xlu0 %1588 }
 0x48e   : > { %v1604_v3 = vpop.permute.xlu0 %1603 }
 0x4d7   : > { %v1526_v9 = vpop.f32.mrb[32].mxu0 }
 0x4d8   : > { %v1527_v23 = vadd.f32 %v1526_v9, %v2903_v13  ;;  %v1528_v16 = vpop.f32.mrb[33].mxu0 }
 0x4d9   : > { %v1529_v26 = vadd.f32 %v1528_v16, %v2907_v17  ;;  %v1530_v28 = vpop.f32.mrb[34].mxu0 }
 0x4da   : > { %v1621_v30 = vadd.f32 %v1584_v37, %v1527_v23  ;;  %v1531_v32 = vadd.f32 %v1530_v28, %v2909_v25  ;;  %v1532_v33 = vpop.f32.mrb[35].mxu0 }
 0x4db   : > { %v1622_v40 = vadd.f32 %v1584_v37, %v1529_v26  ;;  %v1533_v42 = vadd.f32 %v1532_v33, %v2912_v29 }
 0x4dc   : > { %2550 = vtanh.f32 %v1621_v30  ;;  %v1623_v35 = vadd.f32 %v1589_v15, %v1531_v32  ;;  %v1609_v30 = vpop.permute.xlu1 %1608 }
 0x4dd   : > { %2552 = vtanh.f32 %v1622_v40  ;;  %v1624_v43 = vadd.f32 %v1589_v15, %v1533_v42 }
 0x4de   : > { %2554 = vtanh.f32 %v1623_v35 }
 0x4df   : > { %2556 = vtanh.f32 %v1624_v43  ;;  %v1536_v14 = vpop.f32.mrb[36].mxu0 }
 0x4e0   : > { %v1537_v5 = vadd.f32 %v1536_v14, %v2917_v44  ;;  %v1538_v18 = vpop.f32.mrb[37].mxu0 }
 0x4e1   : > { %v1539_v36 = vadd.f32 %v1538_v18, %v2919_v46  ;;  %v1540_v38 = vpop.f32.mrb[38].mxu0 }
 0x4e2   : > { %v1625_v39 = vadd.f32 %v1594_v41, %v1537_v5  ;;  %v1541_v45 = vadd.f32 %v1540_v38, %v2921_v48  ;;  %v1542_v47 = vpop.f32.mrb[39].mxu0 }
 0x4e3   : > { %v1626_v20 = vadd.f32 %v1594_v41, %v1539_v36  ;;  %v1543_v21 = vadd.f32 %v1542_v47, %v2924_v52  ;;  %v1614_v36 = vpop.permute.xlu0 %1613 }
 0x4e4   : > { %2558 = vtanh.f32 %v1625_v39  ;;  %v1627_v22 = vadd.f32 %v1599_v19, %v1541_v45 }
 0x4e5   : > { %2560 = vtanh.f32 %v1626_v20  ;;  %v1628_v6 = vadd.f32 %v1599_v19, %v1543_v21 }
 0x4e6   : > { %v2551_v54 = vpop.eup %2550  ;;  %2562 = vtanh.f32 %v1627_v22  ;;  %v1619_v22 = vpop.permute.xlu1 %1618 }
 0x4e7   : > { %v2553_v55 = vpop.eup %2552  ;;  %2564 = vtanh.f32 %v1628_v6  ;;  %v1546_v58 = vpop.f32.mrb[40].mxu0 }
 0x4e8   : > { %v2555_v60 = vpop.eup %2554  ;;  %v1547_v63 = vadd.f32 %v1546_v58, %v2930_v4  ;;  %v1548_v2 = vpop.f32.mrb[41].mxu0 }
 0x4e9   : > { %v2557_v8 = vpop.eup %2556  ;;  %v1549_v7 = vadd.f32 %v1548_v2, %v2933_v10  ;;  %v1550_v37 = vpop.f32.mrb[42].mxu0  ;;  %v1657_v9 = vpack.c.bf16 %v2555_v60, %v2551_v54 }
 0x4ea   : > { %v1629_v23 = vadd.f32 %v1604_v3, %v1547_v63  ;;  %v1551_v16 = vadd.f32 %v1550_v37, %v2936_v24  ;;  %v1552_v26 = vpop.f32.mrb[43].mxu0  ;;  %v1658_v28 = vpack.c.bf16 %v2557_v8, %v2553_v55 }
 0x4eb   : > { %v1630_v32 = vadd.f32 %v1604_v3, %v1549_v7  ;;  %v1553_v33 = vadd.f32 %v1552_v26, %v2940_v31 }
 0x4ec   : > { %2566 = vtanh.f32 %v1629_v23  ;;  %v1631_v15 = vadd.f32 %v1609_v30, %v1551_v16  ;;  %1705 = vmatprep.subr.bf16.mxu1 %v1658_v28 }
 0x4ed   : > { %2568 = vtanh.f32 %v1630_v32  ;;  %v1632_v40 = vadd.f32 %v1609_v30, %v1553_v33  ;;  %1706 = vmatpush1.bf16.msra.mxu1 %v1657_v9  ;;  %v2548_v30 = vld [vmem:[%s3424_s7] sm:$0xff]   ;;  %v2549_v32 = vld [vmem:[%s3424_s7 + $0x8] sm:$0xff]   ;;  %v1672_v33 = vpop.permute.xlu0 %1671 }
 0x4ee   : > { %v2559_v42 = vpop.eup %2558  ;;  %2570 = vtanh.f32 %v1631_v15 }
 0x4ef   : > { %v2561_v35 = vpop.eup %2560  ;;  %2572 = vtanh.f32 %v1632_v40  ;;  %v1556_v41 = vpop.f32.mrb[44].mxu0 }
 0x4f0   : > { %v2563_v43 = vpop.eup %2562  ;;  %v1557_v14 = vadd.f32 %v1556_v41, %v2946_v50  ;;  %v1558_v5 = vpop.f32.mrb[45].mxu0 }
 0x4f1   : > { %v2565_v18 = vpop.eup %2564  ;;  %v1559_v38 = vadd.f32 %v1558_v5, %v2949_v53  ;;  %v1560_v39 = vpop.f32.mrb[46].mxu0  ;;  %v1659_v45 = vpack.c.bf16 %v2563_v43, %v2559_v42 }
 0x4f2   : > { %v1633_v47 = vadd.f32 %v1614_v36, %v1557_v14  ;;  %v1561_v19 = vadd.f32 %v1560_v39, %v2952_v56  ;;  %v1562_v20 = vpop.f32.mrb[47].mxu0  ;;  %v1660_v21 = vpack.c.bf16 %v2565_v18, %v2561_v35  ;;  %v1677_v35 = vpop.permute.xlu1 %1676 }
 0x4f3   : > { %v1634_v6 = vadd.f32 %v1614_v36, %v1559_v38  ;;  %v1563_v54 = vadd.f32 %v1562_v20, %v2956_v61 }
 0x4f4   : > { %2574 = vtanh.f32 %v1633_v47  ;;  %v1635_v55 = vadd.f32 %v1619_v22, %v1561_v19  ;;  %1707 = vmatprep.subr.bf16.mxu1 %v1660_v21  ;;  %v1682_v21 = vpop.permute.xlu0 %1681 }
 0x4f5   : > { %2576 = vtanh.f32 %v1634_v6  ;;  %v1636_v58 = vadd.f32 %v1619_v22, %v1563_v54  ;;  %1708 = vmatpush1.bf16.msra.mxu1 %v1659_v45 }
 0x4f6   : > { %v2567_v60 = vpop.eup %2566  ;;  %2578 = vtanh.f32 %v1635_v55 }
 0x4f7   : > { %v2569_v63 = vpop.eup %2568  ;;  %2580 = vtanh.f32 %v1636_v58  ;;  %v1687_v58 = vpop.permute.xlu1 %1686 }
 0x4f8   : > { %v2571_v2 = vpop.eup %2570 }
 0x4f9   : > { %v2573_v8 = vpop.eup %2572  ;;  %v1661_v3 = vpack.c.bf16 %v2571_v2, %v2567_v60 }
 0x4fa   : > { %v1662_v7 = vpack.c.bf16 %v2573_v8, %v2569_v63 }
 0x4fc   : > { %1709 = vmatprep.subr.bf16.mxu1 %v1662_v7 }
 0x4fd   : > { %1710 = vmatpush1.bf16.msra.mxu1 %v1661_v3 }
 0x4fe   : > { %v2575_v37 = vpop.eup %2574 }
 0x4ff   : > { %v2577_v9 = vpop.eup %2576 }
 0x500   : > { %v2579_v23 = vpop.eup %2578 }
 0x501   : > { %v2581_v16 = vpop.eup %2580  ;;  %v1663_v26 = vpack.c.bf16 %v2579_v23, %v2575_v37 }
 0x502   : > { %v1664_v28 = vpack.c.bf16 %v2581_v16, %v2577_v9 }
 0x504   : > { %1711 = vmatprep.subr.bf16.mxu1 %v1664_v28 }
 0x505   : > { %1712 = vmatpush1.bf16.msra.mxu1 %v1663_v26 }
 0x508   : > { %2412 = vmatmul.mubr.msk.bf16.vlgmr.msra.gmra.mrb[32].mxu1 %vm844_vm1, %v2548_v30 }
 0x509   : > { %1747 = vmatprep.mubr.bf16.mxu1 %v2640_v0 }
 0x510   : > { %2413 = vmatmul.mubr.msk.bf16.gmra.mrb[36].mxu1 %vm844_vm1, %v2549_v32 }
 0x5db   : > { %v1739_v15 = vpop.f32.mrb[32].mxu1 }
 0x5dc   : > { %v1740_v40 = vadd.f32 %v1739_v15, %v1672_v33  ;;  %v1741_v42 = vpop.f32.mrb[33].mxu1 }
 0x5dd   : > { %v1742_v41 = vadd.f32 %v1741_v42, %v1672_v33  ;;  %v1743_v43 = vpop.f32.mrb[34].mxu1 }
 0x5de   : > { %v1766_v14 = vmul.f32 %v1740_v40, %v2972_v49  ;;  %v1744_v5 = vadd.f32 %v1743_v43, %v1677_v35  ;;  %v1745_v18 = vpop.f32.mrb[35].mxu1 }
 0x5df   : > { %v1767_v36 = vmul.f32 %v1742_v41, %v2975_v51  ;;  %v1746_v38 = vadd.f32 %v1745_v18, %v1677_v35 }
 0x5e0   : > { %v3247_v39 = vadd.f32 %v1766_v14, %v3108_v57  ;;  %v1768_v45 = vmul.f32 %v1744_v5, %v2972_v49 }
 0x5e1   : > { %v3251_v47 = vadd.f32 %v1767_v36, %v3112_v59  ;;  %v1769_v19 = vmul.f32 %v1746_v38, %v2975_v51 }
 0x5e2   : > { %v3255_v20 = vadd.f32 %v1768_v45, %v3116_v62 }
 0x5e3   : > { %v3258_v22 = vadd.f32 %v1769_v19, %v3119_v1  ;;  %v1749_v6 = vpop.f32.mrb[36].mxu1 }
 0x5e4   : > { %v1750_v54 = vadd.f32 %v1749_v6, %v1682_v21  ;;  %v1751_v55 = vpop.f32.mrb[37].mxu1 }
 0x5e5   : > { %v1752_v57 = vadd.f32 %v1751_v55, %v1682_v21  ;;  %v1753_v60 = vpop.f32.mrb[38].mxu1 }
 0x5e6   : > { %v1770_v63 = vmul.f32 %v1750_v54, %v2972_v49  ;;  %v1754_v2 = vadd.f32 %v1753_v60, %v1687_v58  ;;  %v1755_v59 = vpop.f32.mrb[39].mxu1 }
 0x5e7   : > { %v1771_v8 = vmul.f32 %v1752_v57, %v2975_v51  ;;  %v1756_v3 = vadd.f32 %v1755_v59, %v1687_v58 }
 0x5e8   : > { %v3263_v62 = vadd.f32 %v1770_v63, %v3124_v12  ;;  %v1772_v7 = vmul.f32 %v1754_v2, %v2972_v49 }
 0x5e9   : > { %v3267_v1 = vadd.f32 %v1771_v8, %v3128_v27  ;;  %v1773_v37 = vmul.f32 %v1756_v3, %v2975_v51 }
 0x5ea   : > { %v3271_v9 = vadd.f32 %v1772_v7, %v3132_v34 }
 0x5eb   : > { %v3274_v23 = vadd.f32 %v1773_v37, %v3135_v11 }
 0x5ec   : > { %2628 = dma.done.wait [#allocation6 + $0x1], 512 }
 0x5ed   : > { %2629 = vsyncadd [#allocation6 + $0x1], 4294966784  ;;  %v1803_v16 = vpack.c.bf16 %v3255_v20, %v3247_v39  ;;  %v1804_v12 = vpack.c.bf16 %v3258_v22, %v3251_v47  ;;  %v1805_v27 = vpack.c.bf16 %v3271_v9, %v3263_v62  ;;  %v1806_v26 = vpack.c.bf16 %v3274_v23, %v3267_v1  ;;  %1950 = vmatprep.mubr.bf16.mxu1 %v2640_v0  ;;  %1831 = sst [smem:[#allocation14]] %s2642_s29  ;;  %s2654_s25 = smov [#allocation13]  }
 0x5ee   : > { %2582 = vset.pattern.permute.xlu0 %v2640_v0  ;;  %2583 = vset.pattern.permute.xlu1 %v2640_v0  ;;  %1833 = sst [smem:[#allocation14 + $0x1]] %s2642_s29  ;;  %s3433_s18 = smov [#allocation6 + $0x1]  }
 0x5ef   : > { %1807 = vst [vmem:[#allocation5 + $0x20] sm:$0xff] %v1803_v16  ;;  %1808 = vst [vmem:[#allocation5 + $0x28] sm:$0xff] %v1804_v12  ;;  %1918 = vmatprep.subr.bf16.mxu1 %v1804_v12  ;;  %2163 = vmatprep.mubr.bf16.mxu0 %v2640_v0  ;;  %1835 = sst [smem:[#allocation14 + $0x2]] %s2643_s10  ;;  %s2328_s22 = scalar_lea.hbm %s2769_s21, 2048 }
 0x5f0   : > { %1809 = vst [vmem:[#allocation5 + $0x30] sm:$0xff] %v1805_v27  ;;  %1810 = vst [vmem:[#allocation5 + $0x38] sm:$0xff] %v1806_v26  ;;  %1919 = vmatpush1.bf16.msra.mxu1 %v1803_v16  ;;  %1837 = sst [smem:[#allocation14 + $0x3]] %s2644_s16 }
 0x5f1   : > { %1920 = vmatprep.subr.bf16.mxu1 %v1806_v26  ;;  %1839 = sst [smem:[#allocation14 + $0x4]] %s2645_s27 }
 0x5f2   : > { %1841 = sst [smem:[#allocation14 + $0x5]] %s2643_s10 }
 0x5f3   : > { %1843 = sst [smem:[#allocation14 + $0x6]] %s2645_s27 }
 0x5f4   : > { %1921 = vmatpush1.bf16.msra.mxu1 %v1805_v27  ;;  %1845 = sst [smem:[#allocation14 + $0x7]] %s2644_s16 }
 0x5f5   : > { %1847 = sst [smem:[#allocation14 + $0x8]] %s3430_s23 }
 0x5f6   : > { %1849 = dma.general %s974_s20, 512, %s2324_s24, %s3433_s18, %s2654_s25, [#allocation14], %s2649_s12, 0  }
 0x5f7   : > { %v2584_v34 = vld [vmem:[%s3420_s3] sm:$0xff]   ;;  %v1993_v28 = vld [vmem:[%s3423_s6 + $0x10] sm:$0xff]  ;;  %v1992_v30 = vld [vmem:[%s3423_s6 + $0x8] sm:$0xff] }
 0x5f8   : > { %2419 = vmatmul.mubr.msk.bf16.vlgmr.msra.gmra.mrb[40].mxu1 %vm389_vm0, %v2584_v34  ;;  %v1991_v11 = vld [vmem:[%s3423_s6] sm:$0xff]  ;;  %v2001_v33 = vmul.f32 0.75025, %v1993_v28  ;;  %v2585_v15 = vld [vmem:[%s3420_s3 + $0x8] sm:$0xff]   ;;  %v1994_v40 = vld [vmem:[%s3423_s6 + $0x18] sm:$0xff] }
 0x5f9   : > { %1960 = vmatprep.mubr.bf16.mxu1 %v2640_v0  ;;  %v1999_v32 = vmul.f32 0.75025, %v1991_v11  ;;  %v2000_v42 = vmul.f32 0.75025, %v1992_v30  ;;  %v2002_v35 = vmul.f32 0.75025, %v1994_v40 }
 0x5fa   : > { %2019 = vperm.xlu1 %2583, %v2001_v33   ;;  %v1995_v41 = vld [vmem:[%s3423_s6 + $0x20] sm:$0xff]  ;;  %v1996_v43 = vld [vmem:[%s3423_s6 + $0x28] sm:$0xff]  ;;  %v1997_v18 = vld [vmem:[%s3423_s6 + $0x30] sm:$0xff] }
 0x5fb   : > { %2009 = vperm.xlu0 %2582, %v1999_v32   ;;  %v2003_v14 = vmul.f32 0.75025, %v1995_v41  ;;  %v2004_v5 = vmul.f32 0.75025, %v1996_v43  ;;  %v1998_v36 = vld [vmem:[%s3423_s6 + $0x38] sm:$0xff]  ;;  %v2586_v38 = vld [vmem:[%s3420_s3 + $0x10] sm:$0xff]  }
 0x5fc   : > { %v2005_v45 = vmul.f32 0.75025, %v1997_v18  ;;  %v2006_v19 = vmul.f32 0.75025, %v1998_v36  ;;  %v2091_v21 = vld [vmem:[%s3425_s8] sm:$0xff]  ;;  %v2092_v6 = vld [vmem:[%s3425_s8 + $0x8] sm:$0xff] }
 0x5fd   : > { %v2587_v54 = vld [vmem:[%s3420_s3 + $0x18] sm:$0xff]   ;;  %v2093_v55 = vld [vmem:[%s3425_s8 + $0x10] sm:$0xff] }
 0x5fe   : > { %2024 = vperm.xlu1 %2583, %v2002_v35   ;;  %v2094_v58 = vld [vmem:[%s3425_s8 + $0x18] sm:$0xff] }
 0x5ff   : > { %2014 = vperm.xlu0 %2582, %v2000_v42  }
 0x600   : > { %2420 = vmatmul.mubr.msk.bf16.gmra.mrb[44].mxu1 %vm389_vm0, %v2585_v15 }
 0x601   : > { %1970 = vmatprep.mubr.bf16.mxu1 %v2640_v0 }
 0x602   : > { %2034 = vperm.xlu1 %2583, %v2004_v5  }
 0x603   : > { %2029 = vperm.xlu0 %2582, %v2003_v14  }
 0x606   : > { %2044 = vperm.xlu1 %2583, %v2006_v19  }
 0x607   : > { %2039 = vperm.xlu0 %2582, %v2005_v45  }
 0x608   : > { %2421 = vmatmul.mubr.msk.bf16.gmra.mrb[48].mxu1 %vm389_vm0, %v2586_v38 }
 0x609   : > { %1980 = vmatprep.mubr.bf16.mxu1 %v2640_v0 }
 0x60a   : > { %2102 = vperm.xlu1 %2583, %v2092_v6  }
 0x60b   : > { %2097 = vperm.xlu0 %2582, %v2091_v21  }
 0x60e   : > { %2112 = vperm.xlu1 %2583, %v2094_v58  }
 0x60f   : > { %2107 = vperm.xlu0 %2582, %v2093_v55  }
 0x610   : > { %2422 = vmatmul.mubr.msk.bf16.gmra.mrb[52].mxu1 %vm389_vm0, %v2587_v54 }
 0x679   : > { %v2020_v34 = vpop.permute.xlu1 %2019 }
 0x67a   : > { %v2010_v57 = vpop.permute.xlu0 %2009 }
 0x67d   : > { %v2025_v40 = vpop.permute.xlu1 %2024 }
 0x67e   : > { %v2015_v16 = vpop.permute.xlu0 %2014 }
 0x681   : > { %v2035_v55 = vpop.permute.xlu1 %2034 }
 0x6cb   : > { %v1952_v60 = vpop.f32.mrb[40].mxu1 }
 0x6cc   : > { %v1953_v63 = vadd.f32 %v1952_v60, %v2903_v13  ;;  %v1954_v2 = vpop.f32.mrb[41].mxu1 }
 0x6cd   : > { %v1955_v59 = vadd.f32 %v1954_v2, %v2907_v17  ;;  %v1956_v8 = vpop.f32.mrb[42].mxu1 }
 0x6ce   : > { %v2047_v3 = vadd.f32 %v2010_v57, %v1953_v63  ;;  %v1957_v7 = vadd.f32 %v1956_v8, %v2909_v25  ;;  %v1958_v37 = vpop.f32.mrb[43].mxu1 }
 0x6cf   : > { %v2048_v12 = vadd.f32 %v2010_v57, %v1955_v59  ;;  %v1959_v27 = vadd.f32 %v1958_v37, %v2912_v29 }
 0x6d0   : > { %2590 = vtanh.f32 %v2047_v3  ;;  %v2049_v26 = vadd.f32 %v2015_v16, %v1957_v7 }
 0x6d1   : > { %2592 = vtanh.f32 %v2048_v12  ;;  %v2050_v11 = vadd.f32 %v2015_v16, %v1959_v27 }
 0x6d2   : > { %2594 = vtanh.f32 %v2049_v26 }
 0x6d3   : > { %2596 = vtanh.f32 %v2050_v11  ;;  %v1962_v13 = vpop.f32.mrb[44].mxu1  ;;  %v2045_v11 = vpop.permute.xlu1 %2044 }
 0x6d4   : > { %v1963_v28 = vadd.f32 %v1962_v13, %v2917_v44  ;;  %v1964_v17 = vpop.f32.mrb[45].mxu1 }
 0x6d5   : > { %v1965_v30 = vadd.f32 %v1964_v17, %v2919_v46  ;;  %v1966_v32 = vpop.f32.mrb[46].mxu1 }
 0x6d6   : > { %v2051_v25 = vadd.f32 %v2020_v34, %v1963_v28  ;;  %v1967_v33 = vadd.f32 %v1966_v32, %v2921_v48  ;;  %v1968_v15 = vpop.f32.mrb[47].mxu1  ;;  %v2030_v48 = vpop.permute.xlu0 %2029 }
 0x6d7   : > { %v2052_v29 = vadd.f32 %v2020_v34, %v1965_v30  ;;  %v1969_v42 = vadd.f32 %v1968_v15, %v2924_v52 }
 0x6d8   : > { %2598 = vtanh.f32 %v2051_v25  ;;  %v2053_v35 = vadd.f32 %v2025_v40, %v1967_v33 }
 0x6d9   : > { %2600 = vtanh.f32 %v2052_v29  ;;  %v2054_v41 = vadd.f32 %v2025_v40, %v1969_v42 }
 0x6da   : > { %v2591_v43 = vpop.eup %2590  ;;  %2602 = vtanh.f32 %v2053_v35  ;;  %v2040_v7 = vpop.permute.xlu0 %2039 }
 0x6db   : > { %v2593_v14 = vpop.eup %2592  ;;  %2604 = vtanh.f32 %v2054_v41  ;;  %v1972_v44 = vpop.f32.mrb[48].mxu1  ;;  %v2588_v41 = vld [vmem:[%s3424_s7] sm:$0xff]  }
 0x6dc   : > { %v2595_v5 = vpop.eup %2594  ;;  %v1973_v46 = vadd.f32 %v1972_v44, %v2930_v4  ;;  %v1974_v18 = vpop.f32.mrb[49].mxu1 }
 0x6dd   : > { %v2597_v36 = vpop.eup %2596  ;;  %v1975_v38 = vadd.f32 %v1974_v18, %v2933_v10  ;;  %v1976_v45 = vpop.f32.mrb[50].mxu1  ;;  %v2083_v19 = vpack.c.bf16 %v2595_v5, %v2591_v43  ;;  %v2589_v43 = vld [vmem:[%s3424_s7 + $0x8] sm:$0xff]  }
 0x6de   : > { %v2055_v52 = vadd.f32 %v2030_v48, %v1973_v46  ;;  %v1977_v21 = vadd.f32 %v1976_v45, %v2936_v24  ;;  %v1978_v6 = vpop.f32.mrb[51].mxu1  ;;  %v2084_v54 = vpack.c.bf16 %v2597_v36, %v2593_v14  ;;  %v2098_v14 = vpop.permute.xlu0 %2097 }
 0x6df   : > { %v2056_v58 = vadd.f32 %v2030_v48, %v1975_v38  ;;  %v1979_v57 = vadd.f32 %v1978_v6, %v2940_v31  ;;  %v2103_v18 = vpop.permute.xlu1 %2102 }
 0x6e0   : > { %2606 = vtanh.f32 %v2055_v52  ;;  %v2057_v60 = vadd.f32 %v2035_v55, %v1977_v21  ;;  %2131 = vmatprep.subr.bf16.mxu0 %v2084_v54 }
 0x6e1   : > { %2608 = vtanh.f32 %v2056_v58  ;;  %v2058_v4 = vadd.f32 %v2035_v55, %v1979_v57  ;;  %2132 = vmatpush1.bf16.msra.mxu0 %v2083_v19 }
 0x6e2   : > { %v2599_v63 = vpop.eup %2598  ;;  %2610 = vtanh.f32 %v2057_v60  ;;  %v2108_v57 = vpop.permute.xlu0 %2107 }
 0x6e3   : > { %v2601_v10 = vpop.eup %2600  ;;  %2612 = vtanh.f32 %v2058_v4  ;;  %v1982_v2 = vpop.f32.mrb[52].mxu1 }
 0x6e4   : > { %v2603_v59 = vpop.eup %2602  ;;  %v1983_v24 = vadd.f32 %v1982_v2, %v2946_v50  ;;  %v1984_v8 = vpop.f32.mrb[53].mxu1 }
 0x6e5   : > { %v2605_v3 = vpop.eup %2604  ;;  %v1985_v37 = vadd.f32 %v1984_v8, %v2949_v53  ;;  %v1986_v31 = vpop.f32.mrb[54].mxu1  ;;  %v2085_v16 = vpack.c.bf16 %v2603_v59, %v2599_v63 }
 0x6e6   : > { %v2059_v12 = vadd.f32 %v2040_v7, %v1983_v24  ;;  %v1987_v27 = vadd.f32 %v1986_v31, %v2952_v56  ;;  %v1988_v26 = vpop.f32.mrb[55].mxu1  ;;  %v2086_v34 = vpack.c.bf16 %v2605_v3, %v2601_v10  ;;  %v2113_v2 = vpop.permute.xlu1 %2112 }
 0x6e7   : > { %v2060_v13 = vadd.f32 %v2040_v7, %v1985_v37  ;;  %v1989_v28 = vadd.f32 %v1988_v26, %v2956_v61 }
 0x6e8   : > { %2614 = vtanh.f32 %v2059_v12  ;;  %v2061_v17 = vadd.f32 %v2045_v11, %v1987_v27  ;;  %2133 = vmatprep.subr.bf16.mxu0 %v2086_v34 }
 0x6e9   : > { %2616 = vtanh.f32 %v2060_v13  ;;  %v2062_v50 = vadd.f32 %v2045_v11, %v1989_v28  ;;  %2134 = vmatpush1.bf16.msra.mxu0 %v2085_v16 }
 0x6ea   : > { %v2607_v30 = vpop.eup %2606  ;;  %2618 = vtanh.f32 %v2061_v17 }
 0x6eb   : > { %v2609_v53 = vpop.eup %2608  ;;  %2620 = vtanh.f32 %v2062_v50 }
 0x6ec   : > { %v2611_v32 = vpop.eup %2610 }
 0x6ed   : > { %v2613_v25 = vpop.eup %2612  ;;  %v2087_v33 = vpack.c.bf16 %v2611_v32, %v2607_v30 }
 0x6ee   : > { %v2088_v56 = vpack.c.bf16 %v2613_v25, %v2609_v53 }
 0x6f0   : > { %2135 = vmatprep.subr.bf16.mxu0 %v2088_v56 }
 0x6f1   : > { %2136 = vmatpush1.bf16.msra.mxu0 %v2087_v33 }
 0x6f2   : > { %v2615_v15 = vpop.eup %2614 }
 0x6f3   : > { %v2617_v40 = vpop.eup %2616 }
 0x6f4   : > { %v2619_v61 = vpop.eup %2618 }
 0x6f5   : > { %v2621_v29 = vpop.eup %2620  ;;  %v2089_v42 = vpack.c.bf16 %v2619_v61, %v2615_v15 }
 0x6f6   : > { %v2090_v35 = vpack.c.bf16 %v2621_v29, %v2617_v40 }
 0x6f8   : > { %2137 = vmatprep.subr.bf16.mxu0 %v2090_v35 }
 0x6f9   : > { %2138 = vmatpush1.bf16.msra.mxu0 %v2089_v42 }
 0x6fc   : > { %2425 = vmatmul.mubr.msk.bf16.vlgmr.msra.gmra.mrb[48].mxu0 %vm844_vm1, %v2588_v41 }
 0x6fd   : > { %2173 = vmatprep.mubr.bf16.mxu0 %v2640_v0 }
 0x704   : > { %2426 = vmatmul.mubr.msk.bf16.gmra.mrb[52].mxu0 %vm844_vm1, %v2589_v43 }
 0x7cf   : > { %v2165_v44 = vpop.f32.mrb[48].mxu0 }
 0x7d0   : > { %v2166_v5 = vadd.f32 %v2165_v44, %v2098_v14  ;;  %v2167_v46 = vpop.f32.mrb[49].mxu0 }
 0x7d1   : > { %v2168_v36 = vadd.f32 %v2167_v46, %v2098_v14  ;;  %v2169_v48 = vpop.f32.mrb[50].mxu0 }
 0x7d2   : > { %v2192_v38 = vmul.f32 %v2166_v5, %v2972_v49  ;;  %v2170_v45 = vadd.f32 %v2169_v48, %v2103_v18  ;;  %v2171_v19 = vpop.f32.mrb[51].mxu0 }
 0x7d3   : > { %v2193_v0 = vmul.f32 %v2168_v36, %v2975_v51  ;;  %v2172_v52 = vadd.f32 %v2171_v19, %v2103_v18 }
 0x7d4   : > { %v2200_v21 = vadd.f32 %v2192_v38, %v3247_v39  ;;  %v2194_v6 = vmul.f32 %v2170_v45, %v2972_v49 }
 0x7d5   : > { %v2201_v54 = vadd.f32 %v2193_v0, %v3251_v47  ;;  %v2195_v55 = vmul.f32 %v2172_v52, %v2975_v51 }
 0x7d6   : > { %v2202_v58 = vadd.f32 %v2194_v6, %v3255_v20 }
 0x7d7   : > { %v2203_v60 = vadd.f32 %v2195_v55, %v3258_v22  ;;  %v2175_v4 = vpop.f32.mrb[52].mxu0 }
 0x7d8   : > { %v2176_v63 = vadd.f32 %v2175_v4, %v2108_v57  ;;  %v2177_v10 = vpop.f32.mrb[53].mxu0 }
 0x7d9   : > { %v2178_v59 = vadd.f32 %v2177_v10, %v2108_v57  ;;  %v2179_v24 = vpop.f32.mrb[54].mxu0 }
 0x7da   : > { %v2196_v8 = vmul.f32 %v2176_v63, %v2972_v49  ;;  %v2180_v39 = vadd.f32 %v2179_v24, %v2113_v2  ;;  %v2181_v3 = vpop.f32.mrb[55].mxu0 }
 0x7db   : > { %v2197_v7 = vmul.f32 %v2178_v59, %v2975_v51  ;;  %v2182_v47 = vadd.f32 %v2181_v3, %v2113_v2 }
 0x7dc   : > { %v2204_v37 = vadd.f32 %v2196_v8, %v3263_v62  ;;  %v2198_v20 = vmul.f32 %v2180_v39, %v2972_v49 }
 0x7dd   : > { %v2205_v31 = vadd.f32 %v2197_v7, %v3267_v1  ;;  %v2199_v22 = vmul.f32 %v2182_v47, %v2975_v51 }
 0x7de   : > { %v2206_v16 = vadd.f32 %v2198_v20, %v3271_v9 }
 0x7df   : > { %v2207_v12 = vadd.f32 %v2199_v22, %v3274_v23 }
 0x7e0   : > { %2630 = dma.done.wait [#allocation6], 512 }
 0x7e1   : > { %2631 = vsyncadd [#allocation6], 4294966784  ;;  %v2229_v27 = vpack.c.bf16 %v2202_v58, %v2200_v21  ;;  %v2230_v26 = vpack.c.bf16 %v2203_v60, %v2201_v54  ;;  %v2231_v34 = vpack.c.bf16 %v2206_v16, %v2204_v37  ;;  %v2232_v11 = vpack.c.bf16 %v2207_v12, %v2205_v31  ;;  %2257 = sst [smem:[#allocation16]] %s2642_s29  ;;  %s3434_s13 = smov 4  }
 0x7e2   : > { %2259 = sst [smem:[#allocation16 + $0x1]] %s2642_s29  ;;  %s2655_s23 = smov [#allocation15]  }
 0x7e3   : > { %2233 = vst [vmem:[#allocation5] sm:$0xff] %v2229_v27  ;;  %2234 = vst [vmem:[#allocation5 + $0x8] sm:$0xff] %v2230_v26  ;;  %2261 = sst [smem:[#allocation16 + $0x2]] %s2643_s10 }
 0x7e4   : > { %2235 = vst [vmem:[#allocation5 + $0x10] sm:$0xff] %v2231_v34  ;;  %2236 = vst [vmem:[#allocation5 + $0x18] sm:$0xff] %v2232_v11  ;;  %2263 = sst [smem:[#allocation16 + $0x3]] %s2644_s16 }
 0x7e5   : > { %2265 = sst [smem:[#allocation16 + $0x4]] %s2645_s27 }
 0x7e6   : > { %2267 = sst [smem:[#allocation16 + $0x5]] %s2643_s10 }
 0x7e7   : > { %2269 = sst [smem:[#allocation16 + $0x6]] %s2645_s27 }
 0x7e8   : > { %2271 = sst [smem:[#allocation16 + $0x7]] %s2644_s16 }
 0x7e9   : > { %2273 = sst [smem:[#allocation16 + $0x8]] %s3434_s13 }
 0x7ea   : > { %2275 = dma.general %s2782_s28, 512, %s2328_s22, %s3431_s19, %s2655_s23, [#allocation16], %s2649_s12, 0  }
 0x7eb   : > { %2632 = dma.done.wait [#allocation6 + $0x1], 512 }
 0x7ec   : > { %2633 = vsyncadd [#allocation6 + $0x1], 4294966784 }
 0x7ed   : > { %2634 = dma.done.wait [#allocation6], 512 }
 0x7ee   : > { %2635 = vsyncadd [#allocation6], 4294966784 }
 0x7ef PF: > { %s19_s30 = sadd.s32 1, %s2638_s30  }
 0x7f0   : > { %p16_p2 = scmp.ge.s32.totalorder %s19_s30, 3  }
 0x7f2   :  { %18 = sbr.rel (!%p16_p2) target bundleno = 1 (0x1), region = 124 }
 0x7f9   :  { %2280 = vsyncmov [#allocation6] }
 0x7fc   :  { %s2281_s29 = vpop.sfrf %2280 }
 0x7fd   :  { %p2428_p3 = scmp.ne.s32.totalorder %s2281_s29, 0 }
 0x7ff   :  { %2285 = shalt.err (%p2428_p3)  }
 0x800   :  { %2287 = vsyncmov [#allocation6 + $0x1] }
 0x803   :  { %s2288_s10 = vpop.sfrf %2287 }
 0x804   :  { %p2429_p4 = scmp.ne.s32.totalorder %s2288_s10, 0 }
 0x806   :  { %2292 = shalt.err (%p2429_p4)  }

</bundles_post_ra>
